<compile_context>
chip_gen: v6e
topology: v6e:2x2x1
jax: 0.10.0
libtpu: 0.0.40
codegen_flags: <defaults>
</compile_context>

<pallas_src>
import jax
import jax.numpy as jnp
from jax.experimental import pallas as pl
from jax.experimental.pallas import tpu as pltpu  # noqa: F401  (TPU backend import)

EPS = 1e-5


def _bn_scale_shift(h, gamma, beta):
    """Training-mode BatchNorm1d (biased variance), single pass, f32 stats."""
    inv_n = 1.0 / h.shape[0]
    s = jnp.sum(h, axis=0, keepdims=True)
    ss = jnp.sum(h * h, axis=0, keepdims=True)
    mu = s * inv_n
    var = ss * inv_n - mu * mu
    scale = gamma * jax.lax.rsqrt(var + EPS)   # rsqrt -> EUP slot
    shift = beta - mu * scale
    return h * scale + shift                   # one fused FMA-style VPU op


def label_predictor_kernel(
    x_ref,                     # (B, 128)   f32
    w1_ref, g1_ref, be1_ref,   # (128,1024) f32, (1,1024) f32, (1,1024) f32
    w2_ref, g2_ref, be2_ref,   # (1024,256) f32, (1,256)  f32, (1,256)  f32
    w3_ref, b3_ref,            # (256,C)    f32, (1,C)    f32
    out_ref,                   # (B, C)     f32
):
    # ---- Linear(128,1024) [bias cancelled by BN] + BN + ReLU ----
    xb = x_ref[...].astype(jnp.bfloat16)                 # in-VMEM narrow for MXU
    h1 = jnp.dot(xb, w1_ref[...].astype(jnp.bfloat16),
                 preferred_element_type=jnp.float32)
    h1 = _bn_scale_shift(h1, g1_ref[...], be1_ref[...])
    h1 = jnp.maximum(h1, 0.0).astype(jnp.bfloat16)

    # ---- Linear(1024,256) [bias cancelled by BN] + BN + ReLU ----
    h2 = jnp.dot(h1, w2_ref[...].astype(jnp.bfloat16),
                 preferred_element_type=jnp.float32)
    h2 = _bn_scale_shift(h2, g2_ref[...], be2_ref[...])
    h2 = jnp.maximum(h2, 0.0).astype(jnp.bfloat16)

    # ---- Linear(256, n_classes) ----
    out = jnp.dot(h2, w3_ref[...].astype(jnp.bfloat16),
                  preferred_element_type=jnp.float32) + b3_ref[...]
    out_ref[...] = out.astype(out_ref.dtype)


def label_predictor(x, params):
    (w1, b1, g1, be1, w2, b2, g2, be2, w3, b3) = params
    del b1, b2  # exactly cancelled by the training-mode BatchNorm mean-subtract
    B = x.shape[0]
    n_classes = w3.shape[1]

    flops = 2 * B * (128 * 1024 + 1024 * 256 + 256 * n_classes)
    bytes_accessed = 4 * (
        x.size + w1.size + g1.size + be1.size
        + w2.size + g2.size + be2.size
        + w3.size + b3.size + B * n_classes
    )

    return pl.pallas_call(
        label_predictor_kernel,
        out_shape=jax.ShapeDtypeStruct((B, n_classes), jnp.float32),
        # Single program; whole arrays fit VMEM (default whole-array BlockSpecs).
        # Full batch in one program keeps BatchNorm statistics exact.
        cost_estimate=pl.CostEstimate(
            flops=flops,
            transcendentals=1024 + 256,  # two rsqrt rows
            bytes_accessed=bytes_accessed,
        ),
    )(x, w1, g1, be1, w2, g2, be2, w3, b3)


def init_params(key, n_classes=10):
    """Deterministic synthetic parameters matching the module's shapes."""
    ks = jax.random.split(key, 6)

    def linear(kw, kb, fan_in, fan_out):
        bound = 1.0 / jnp.sqrt(fan_in)
        w = jax.random.uniform(kw, (fan_in, fan_out), jnp.float32, -bound, bound)
        b = jax.random.uniform(kb, (1, fan_out), jnp.float32, -bound, bound)
        return w, b

    w1, b1 = linear(ks[0], ks[1], 128, 1024)
    w2, b2 = linear(ks[2], ks[3], 1024, 256)
    w3, b3 = linear(ks[4], ks[5], 256, n_classes)
    g1, be1 = jnp.ones((1, 1024), jnp.float32), jnp.zeros((1, 1024), jnp.float32)
    g2, be2 = jnp.ones((1, 256), jnp.float32), jnp.zeros((1, 256), jnp.float32)
    return (w1, b1, g1, be1, w2, b2, g2, be2, w3, b3)


def _bn_ref(h, gamma, beta):
    mu = jnp.mean(h, axis=0, keepdims=True)
    var = jnp.mean((h - mu) * (h - mu), axis=0, keepdims=True)
    return (h - mu) * jax.lax.rsqrt(var + EPS) * gamma + beta


def label_predictor_ref(x, params):
    """Pure-JAX reference mirroring the kernel's bf16 matmul path.

    Biases b1/b2 are *kept* here (as in the PyTorch module) — they are cancelled
    by the training-mode BatchNorm, so the kernel (which drops them) must match.
    """
    (w1, b1, g1, be1, w2, b2, g2, be2, w3, b3) = params
    f32 = jnp.float32
    xb = x.astype(jnp.bfloat16).astype(f32)
    w1b = w1.astype(jnp.bfloat16).astype(f32)
    w2b = w2.astype(jnp.bfloat16).astype(f32)
    w3b = w3.astype(jnp.bfloat16).astype(f32)

    h = xb @ w1b + b1
    h = _bn_ref(h, g1, be1)
    h = jnp.maximum(h, 0.0).astype(jnp.bfloat16).astype(f32)
    h = h @ w2b + b2
    h = _bn_ref(h, g2, be2)
    h = jnp.maximum(h, 0.0).astype(jnp.bfloat16).astype(f32)
    return h @ w3b + b3


if __name__ == "__main__":
    key = jax.random.PRNGKey(0)
    kx, kp = jax.random.split(key)

    B, IN, N_CLASSES = 8, 128, 10
    x = jax.random.normal(kx, (B, IN), jnp.float32)
    params = init_params(kp, n_classes=N_CLASSES)

    out = jax.block_until_ready(label_predictor(x, params))
    ref = jax.block_until_ready(label_predictor_ref(x, params))

    assert out.shape == (B, N_CLASSES), out.shape
    assert bool(jnp.allclose(out, ref, atol=1e-2, rtol=1e-2)), "mismatch vs JAX reference"
    print("KERNEL_OK")
</pallas_src>

<mosaic_0001>
module attributes {stable_mosaic.version = 11 : i64} {
  func.func @label_predictor_kernel(%arg0: memref<8x128xf32, #tpu.memory_space<vmem>>, %arg1: memref<128x1024xf32, #tpu.memory_space<vmem>>, %arg2: memref<1x1024xf32, #tpu.memory_space<vmem>>, %arg3: memref<1x1024xf32, #tpu.memory_space<vmem>>, %arg4: memref<1024x256xf32, #tpu.memory_space<vmem>>, %arg5: memref<1x256xf32, #tpu.memory_space<vmem>>, %arg6: memref<1x256xf32, #tpu.memory_space<vmem>>, %arg7: memref<256x10xf32, #tpu.memory_space<vmem>>, %arg8: memref<1x10xf32, #tpu.memory_space<vmem>>, %arg9: memref<8x10xf32, #tpu.memory_space<vmem>>) attributes {dimension_semantics = [], scalar_prefetch = 0 : i64, scratch_operands = 0 : i64, tpu.core_type = #tpu.core_type<tc>} {
    %c0 = arith.constant 0 : index
    %c0_0 = arith.constant 0 : index
    %0 = vector.load %arg0[%c0, %c0_0] : memref<8x128xf32, #tpu.memory_space<vmem>>, vector<8x128xf32>
    %1 = arith.truncf %0 : vector<8x128xf32> to vector<8x128xbf16>
    %c0_1 = arith.constant 0 : index
    %c0_2 = arith.constant 0 : index
    %2 = vector.load %arg1[%c0_1, %c0_2] : memref<128x1024xf32, #tpu.memory_space<vmem>>, vector<128x1024xf32>
    %3 = arith.truncf %2 : vector<128x1024xf32> to vector<128x1024xbf16>
    %cst = arith.constant dense<0.000000e+00> : vector<8x1024xf32>
    %4 = tpu.matmul %1, %3, %cst {dimension_numbers = #tpu.dot_dimension_numbers<[1], [0], [0], [1], [0, 0, 1, 1], [], []>} : vector<8x128xbf16>, vector<128x1024xbf16>, vector<8x1024xf32> -> vector<8x1024xf32>
    %c0_3 = arith.constant 0 : index
    %c0_4 = arith.constant 0 : index
    %5 = vector.load %arg2[%c0_3, %c0_4] : memref<1x1024xf32, #tpu.memory_space<vmem>>, vector<1x1024xf32>
    %c0_5 = arith.constant 0 : index
    %c0_6 = arith.constant 0 : index
    %6 = vector.load %arg3[%c0_5, %c0_6] : memref<1x1024xf32, #tpu.memory_space<vmem>>, vector<1x1024xf32>
    %cst_7 = arith.constant dense<0.000000e+00> : vector<1024xf32>
    %7 = vector.multi_reduction <add>, %4, %cst_7 [0] : vector<8x1024xf32> to vector<1024xf32>
    %8 = vector.shape_cast %7 : vector<1024xf32> to vector<1x1024xf32>
    %9 = arith.mulf %4, %4 : vector<8x1024xf32>
    %cst_8 = arith.constant dense<0.000000e+00> : vector<1024xf32>
    %10 = vector.multi_reduction <add>, %9, %cst_8 [0] : vector<8x1024xf32> to vector<1024xf32>
    %11 = vector.shape_cast %10 : vector<1024xf32> to vector<1x1024xf32>
    %cst_9 = arith.constant 1.250000e-01 : f32
    %12 = vector.broadcast %cst_9 : f32 to vector<1x1024xf32>
    %13 = arith.mulf %8, %12 : vector<1x1024xf32>
    %cst_10 = arith.constant 1.250000e-01 : f32
    %14 = vector.broadcast %cst_10 : f32 to vector<1x1024xf32>
    %15 = arith.mulf %11, %14 : vector<1x1024xf32>
    %16 = arith.mulf %13, %13 : vector<1x1024xf32>
    %17 = arith.subf %15, %16 : vector<1x1024xf32>
    %cst_11 = arith.constant 9.99999974E-6 : f32
    %18 = vector.broadcast %cst_11 : f32 to vector<1x1024xf32>
    %19 = arith.addf %17, %18 : vector<1x1024xf32>
    %20 = math.rsqrt %19 : vector<1x1024xf32>
    %21 = arith.mulf %5, %20 : vector<1x1024xf32>
    %22 = arith.mulf %13, %21 : vector<1x1024xf32>
    %23 = arith.subf %6, %22 : vector<1x1024xf32>
    %24 = vector.broadcast %21 : vector<1x1024xf32> to vector<8x1024xf32>
    %25 = arith.mulf %4, %24 : vector<8x1024xf32>
    %26 = vector.broadcast %23 : vector<1x1024xf32> to vector<8x1024xf32>
    %27 = arith.addf %25, %26 : vector<8x1024xf32>
    %cst_12 = arith.constant 0.000000e+00 : f32
    %28 = vector.broadcast %cst_12 : f32 to vector<8x1024xf32>
    %29 = arith.maximumf %27, %28 : vector<8x1024xf32>
    %30 = arith.truncf %29 : vector<8x1024xf32> to vector<8x1024xbf16>
    %c0_13 = arith.constant 0 : index
    %c0_14 = arith.constant 0 : index
    %31 = vector.load %arg4[%c0_13, %c0_14] : memref<1024x256xf32, #tpu.memory_space<vmem>>, vector<1024x256xf32>
    %32 = arith.truncf %31 : vector<1024x256xf32> to vector<1024x256xbf16>
    %cst_15 = arith.constant dense<0.000000e+00> : vector<8x256xf32>
    %33 = tpu.matmul %30, %32, %cst_15 {dimension_numbers = #tpu.dot_dimension_numbers<[1], [0], [0], [1], [0, 0, 1, 1], [], []>} : vector<8x1024xbf16>, vector<1024x256xbf16>, vector<8x256xf32> -> vector<8x256xf32>
    %c0_16 = arith.constant 0 : index
    %c0_17 = arith.constant 0 : index
    %34 = vector.load %arg5[%c0_16, %c0_17] : memref<1x256xf32, #tpu.memory_space<vmem>>, vector<1x256xf32>
    %c0_18 = arith.constant 0 : index
    %c0_19 = arith.constant 0 : index
    %35 = vector.load %arg6[%c0_18, %c0_19] : memref<1x256xf32, #tpu.memory_space<vmem>>, vector<1x256xf32>
    %cst_20 = arith.constant dense<0.000000e+00> : vector<256xf32>
    %36 = vector.multi_reduction <add>, %33, %cst_20 [0] : vector<8x256xf32> to vector<256xf32>
    %37 = vector.shape_cast %36 : vector<256xf32> to vector<1x256xf32>
    %38 = arith.mulf %33, %33 : vector<8x256xf32>
    %cst_21 = arith.constant dense<0.000000e+00> : vector<256xf32>
    %39 = vector.multi_reduction <add>, %38, %cst_21 [0] : vector<8x256xf32> to vector<256xf32>
    %40 = vector.shape_cast %39 : vector<256xf32> to vector<1x256xf32>
    %cst_22 = arith.constant 1.250000e-01 : f32
    %41 = vector.broadcast %cst_22 : f32 to vector<1x256xf32>
    %42 = arith.mulf %37, %41 : vector<1x256xf32>
    %cst_23 = arith.constant 1.250000e-01 : f32
    %43 = vector.broadcast %cst_23 : f32 to vector<1x256xf32>
    %44 = arith.mulf %40, %43 : vector<1x256xf32>
    %45 = arith.mulf %42, %42 : vector<1x256xf32>
    %46 = arith.subf %44, %45 : vector<1x256xf32>
    %cst_24 = arith.constant 9.99999974E-6 : f32
    %47 = vector.broadcast %cst_24 : f32 to vector<1x256xf32>
    %48 = arith.addf %46, %47 : vector<1x256xf32>
    %49 = math.rsqrt %48 : vector<1x256xf32>
    %50 = arith.mulf %34, %49 : vector<1x256xf32>
    %51 = arith.mulf %42, %50 : vector<1x256xf32>
    %52 = arith.subf %35, %51 : vector<1x256xf32>
    %53 = vector.broadcast %50 : vector<1x256xf32> to vector<8x256xf32>
    %54 = arith.mulf %33, %53 : vector<8x256xf32>
    %55 = vector.broadcast %52 : vector<1x256xf32> to vector<8x256xf32>
    %56 = arith.addf %54, %55 : vector<8x256xf32>
    %cst_25 = arith.constant 0.000000e+00 : f32
    %57 = vector.broadcast %cst_25 : f32 to vector<8x256xf32>
    %58 = arith.maximumf %56, %57 : vector<8x256xf32>
    %59 = arith.truncf %58 : vector<8x256xf32> to vector<8x256xbf16>
    %c0_26 = arith.constant 0 : index
    %c0_27 = arith.constant 0 : index
    %60 = vector.load %arg7[%c0_26, %c0_27] : memref<256x10xf32, #tpu.memory_space<vmem>>, vector<256x10xf32>
    %61 = arith.truncf %60 : vector<256x10xf32> to vector<256x10xbf16>
    %cst_28 = arith.constant dense<0.000000e+00> : vector<8x10xf32>
    %62 = tpu.matmul %59, %61, %cst_28 {dimension_numbers = #tpu.dot_dimension_numbers<[1], [0], [0], [1], [0, 0, 1, 1], [], []>} : vector<8x256xbf16>, vector<256x10xbf16>, vector<8x10xf32> -> vector<8x10xf32>
    %c0_29 = arith.constant 0 : index
    %c0_30 = arith.constant 0 : index
    %63 = vector.load %arg8[%c0_29, %c0_30] : memref<1x10xf32, #tpu.memory_space<vmem>>, vector<1x10xf32>
    %64 = vector.broadcast %63 : vector<1x10xf32> to vector<8x10xf32>
    %65 = arith.addf %62, %64 : vector<8x10xf32>
    %c0_31 = arith.constant 0 : index
    %c0_32 = arith.constant 0 : index
    %66 = vector.load %arg9[%c0_31, %c0_32] : memref<8x10xf32, #tpu.memory_space<vmem>>, vector<8x10xf32>
    tpu.vector_store %arg9[%c0_31, %c0_32], %65 {strides = array<i32>} : memref<8x10xf32, #tpu.memory_space<vmem>>, vector<8x10xf32>,
    return
  }
}

</mosaic_0001>

<bundles_post_ra>
// kernel: tpu_custom_call.1
= control target key start
LH: loop header
LB: loop body
LE: loop exit
PB: predicated region body
PF: predicated region fallthrough
CT: control target
= control target key end

     0   :  { %14 = vsyncpa [#allocation3], 0  ;;  %s2057_s0 = inlined_call_operand.vmem [shape: f32[8,128], index: 0, kind: input, shape index: {}]   ;;  %s2058_s1 = inlined_call_operand.hbm [shape: f32[128,1024], index: 1, kind: input, shape index: {}]   ;;  %s2059_s2 = inlined_call_operand.vmem [shape: f32[1,1024], index: 2, kind: input, shape index: {}]   ;;  %s2060_s3 = inlined_call_operand.vmem [shape: f32[1,1024], index: 3, kind: input, shape index: {}]   ;;  %s2061_s4 = inlined_call_operand.hbm [shape: f32[1024,256], index: 4, kind: input, shape index: {}]   ;;  %s2062_s5 = inlined_call_operand.vmem [shape: f32[1,256], index: 5, kind: input, shape index: {}]   ;;  %s2063_s6 = inlined_call_operand.vmem [shape: f32[1,256], index: 6, kind: input, shape index: {}]   ;;  %s2064_s7 = inlined_call_operand.vmem [shape: f32[256,10], index: 7, kind: input, shape index: {}]   ;;  %s2065_s8 = inlined_call_operand.vmem [shape: f32[1,10], index: 8, kind: input, shape index: {}]   ;;  %s2066_s9 = inlined_call_operand.hbm [shape: f32[8,10], index: 9, kind: output, shape index: {}]  }
   0x1   :  { %15 = vsyncpa [#allocation6], 0 }
   0x2   :  { %16 = vsyncpa [#allocation4], 0  ;;  %s1703_s30 = smov [#allocation2]  }
   0x3   :  { %s24_s10 = sshll.u32 %s1703_s30, 4  ;;  %s25_s10 = int_to_ptr.vmem [resolvable:$true] %s24_s10 }
   0x4   :  { %s1645_s11 = scalar_lea.vmem %s25_s10, 16384  ;;  %p1650_p1 = scmp.lt.s32.totalorder %s25_s10, %s25_s10 }
   0x5   :  { %p1646_p0 = scmp.ne.s32.totalorder %s25_s10, %s1645_s11  ;;  %p1651_p2 = scmp.lt.s32.totalorder %s1645_s11, %s1645_s11 }
   0x7   :  { %p1652_p3 = por %p1651_p2, %p1650_p1 }
   0x9   :  { %p1653_p4 = pnand %p1652_p3, %p1646_p0 }
   0xb   :  { %1656 = shalt.err (!%p1653_p4)
}
   0xc   :  { %s1704_s12 = smov 1024   ;;  %s1705_s13 = smov 64  }
   0xd   :  { %30 = dma.hbm_to_vmem [thread:$0]  %s2058_s1, 16384, %s25_s10, [#allocation3], %s1704_s12, %s1704_s12, %s1705_s13  }
   0xe   :  { %s1706_s16 = smov [#allocation5]  }
   0xf   :  { %s40_s17 = sshll.u32 %s1706_s16, 4  ;;  %s41_s17 = int_to_ptr.vmem [resolvable:$true] %s40_s17 }
  0x10   :  { %s1665_s18 = scalar_lea.vmem %s41_s17, 32768  ;;  %p1670_p6 = scmp.lt.s32.totalorder %s41_s17, %s41_s17 }
  0x11   :  { %p1666_p5 = scmp.ne.s32.totalorder %s41_s17, %s1665_s18  ;;  %p1671_p7 = scmp.lt.s32.totalorder %s1665_s18, %s1665_s18 }
  0x13   :  { %p1672_p8 = por %p1671_p7, %p1670_p6 }
  0x15   :  { %p1673_p9 = pnand %p1672_p8, %p1666_p5 }
  0x17   :  { %1676 = shalt.err (!%p1673_p9)
}
  0x18   :  { %s1707_s19 = smov 256   ;;  %s1708_s20 = smov 16  }
  0x19   :  { %46 = dma.hbm_to_vmem [thread:$0]  %s2061_s4, 32768, %s41_s17, [#allocation6], %s1707_s19, %s1707_s19, %s1708_s20  }
  0x1a   :  { %1697 = dma.done.wait [#allocation3], 16384  }
  0x1b   :  { %1698 = vsyncadd [#allocation3], 4294950912 }
  0x1c   :  { %1699 = dma.done.wait [#allocation6], 32768  }
  0x1d   :  { %1700 = vsyncadd [#allocation6], 4294934528  ;;  %v1709_v0 = vmov 0   ;;  %v177_v1 = vld [vmem:[#allocation2 + $0x388] sm:$0xff]  ;;  %v179_v3 = vld [vmem:[#allocation2 + $0x398] sm:$0xff]  ;;  %s1711_s18 = smov [#allocation7]  }
  0x1e   :  { %288 = vmatprep.mubr.bf16.mxu0 %v1709_v0  ;;  %329 = vmatprep.mubr.bf16.mxu1 %v1709_v0  ;;  %v185_v2 = vld [vmem:[#allocation2 + $0x3c8] sm:$0xff]  ;;  %v187_v5 = vld [vmem:[#allocation2 + $0x3d8] sm:$0xff]  ;;  %v176_v6 = vld [vmem:[#allocation2 + $0x380] sm:$0xff]  ;;  %s1575_s19 = sshll.u32 %s1711_s18, 4  ;;  %vm1567_vm0 = vcmask 80896   ;;  %s1576_s19 = int_to_ptr.vmem [resolvable:$true] %s1575_s19 }
  0x1f   :  { %v249_v4 = vpack.c.bf16 %v185_v2, %v177_v1  ;;  %v184_v7 = vld [vmem:[#allocation2 + $0x3c0] sm:$0xff]  ;;  %v251_v8 = vpack.c.bf16 %v187_v5, %v179_v3  ;;  %v178_v10 = vld [vmem:[#allocation2 + $0x390] sm:$0xff]  ;;  %v161_v12 = vld [vmem:[#allocation2 + $0x308] sm:$0xff]  ;;  %s1677_s20 = scalar_lea.vmem %s1576_s19, 128  ;;  %p1682_p11 = scmp.lt.s32.totalorder %s1576_s19, %s1576_s19 }
  0x20   :  { %v248_v9 = vpack.c.bf16 %v184_v7, %v176_v6  ;;  %v186_v11 = vld [vmem:[#allocation2 + $0x3d0] sm:$0xff]  ;;  %v169_v14 = vld [vmem:[#allocation2 + $0x348] sm:$0xff]  ;;  %v163_v15 = vld [vmem:[#allocation2 + $0x318] sm:$0xff]  ;;  %p1678_p10 = scmp.ne.s32.totalorder %s1576_s19, %s1677_s20  ;;  %p1683_p12 = scmp.lt.s32.totalorder %s1677_s20, %s1677_s20 }
  0x21   :  { %256 = vmatprep.subr.bf16.mxu0 %v249_v4  ;;  %v250_v13 = vpack.c.bf16 %v186_v11, %v178_v10  ;;  %v171_v16 = vld [vmem:[#allocation2 + $0x358] sm:$0xff]  ;;  %297 = vmatprep.subr.bf16.mxu1 %v251_v8  ;;  %v241_v17 = vpack.c.bf16 %v169_v14, %v161_v12  ;;  %v160_v19 = vld [vmem:[#allocation2 + $0x300] sm:$0xff]  ;;  %v162_v21 = vld [vmem:[#allocation2 + $0x310] sm:$0xff] }
  0x22   :  { %257 = vmatpush1.bf16.msra.mxu0 %v248_v9  ;;  %v243_v18 = vpack.c.bf16 %v171_v16, %v163_v15  ;;  %v168_v20 = vld [vmem:[#allocation2 + $0x340] sm:$0xff]  ;;  %v170_v23 = vld [vmem:[#allocation2 + $0x350] sm:$0xff]  ;;  %v145_v24 = vld [vmem:[#allocation2 + $0x288] sm:$0xff]  ;;  %p1684_p13 = por %p1683_p12, %p1682_p11 }
  0x23   :  { %298 = vmatpush1.bf16.msra.mxu1 %v250_v13  ;;  %v240_v22 = vpack.c.bf16 %v168_v20, %v160_v19  ;;  %v153_v25 = vld [vmem:[#allocation2 + $0x2c8] sm:$0xff]  ;;  %258 = vmatprep.subr.bf16.mxu0 %v241_v17  ;;  %v242_v26 = vpack.c.bf16 %v170_v23, %v162_v21  ;;  %v147_v28 = vld [vmem:[#allocation2 + $0x298] sm:$0xff]  ;;  %v144_v30 = vld [vmem:[#allocation2 + $0x280] sm:$0xff] }
  0x24   :  { %299 = vmatprep.subr.bf16.mxu1 %v243_v18  ;;  %v233_v27 = vpack.c.bf16 %v153_v25, %v145_v24  ;;  %v155_v29 = vld [vmem:[#allocation2 + $0x2d8] sm:$0xff]  ;;  %v152_v32 = vld [vmem:[#allocation2 + $0x2c0] sm:$0xff]  ;;  %v146_v33 = vld [vmem:[#allocation2 + $0x290] sm:$0xff]  ;;  %p1685_p0 = pnand %p1684_p13, %p1678_p10 }
  0x25   :  { %v235_v31 = vpack.c.bf16 %v155_v29, %v147_v28  ;;  %v154_v34 = vld [vmem:[#allocation2 + $0x2d0] sm:$0xff]  ;;  %v232_v35 = vpack.c.bf16 %v152_v32, %v144_v30  ;;  %v129_v36 = vld [vmem:[#allocation2 + $0x208] sm:$0xff]  ;;  %v131_v38 = vld [vmem:[#allocation2 + $0x218] sm:$0xff] }
  0x26   :  { %259 = vmatpush1.bf16.msra.mxu0 %v240_v22  ;;  %v137_v37 = vld [vmem:[#allocation2 + $0x248] sm:$0xff]  ;;  %v234_v39 = vpack.c.bf16 %v154_v34, %v146_v33  ;;  %v139_v41 = vld [vmem:[#allocation2 + $0x258] sm:$0xff]  ;;  %v128_v42 = vld [vmem:[#allocation2 + $0x200] sm:$0xff] }
  0x27   :  { %300 = vmatpush1.bf16.msra.mxu1 %v242_v26  ;;  %260 = vmatprep.subr.bf16.mxu0 %v233_v27  ;;  %v225_v40 = vpack.c.bf16 %v137_v37, %v129_v36  ;;  %v136_v43 = vld [vmem:[#allocation2 + $0x240] sm:$0xff]  ;;  %v227_v44 = vpack.c.bf16 %v139_v41, %v131_v38  ;;  %v130_v45 = vld [vmem:[#allocation2 + $0x210] sm:$0xff]  ;;  %v113_v47 = vld [vmem:[#allocation2 + $0x188] sm:$0xff] }
  0x28   :  { %301 = vmatprep.subr.bf16.mxu1 %v235_v31  ;;  %v138_v46 = vld [vmem:[#allocation2 + $0x250] sm:$0xff]  ;;  %v121_v48 = vld [vmem:[#allocation2 + $0x1c8] sm:$0xff]  ;;  %v115_v49 = vld [vmem:[#allocation2 + $0x198] sm:$0xff]  ;;  %v224_v51 = vpack.c.bf16 %v136_v43, %v128_v42 }
  0x29   :  { %v123_v50 = vld [vmem:[#allocation2 + $0x1d8] sm:$0xff]  ;;  %v226_v52 = vpack.c.bf16 %v138_v46, %v130_v45  ;;  %v217_v53 = vpack.c.bf16 %v121_v48, %v113_v47  ;;  %v112_v54 = vld [vmem:[#allocation2 + $0x180] sm:$0xff]  ;;  %v114_v56 = vld [vmem:[#allocation2 + $0x190] sm:$0xff] }
  0x2a   :  { %261 = vmatpush1.bf16.msra.mxu0 %v232_v35  ;;  %v120_v55 = vld [vmem:[#allocation2 + $0x1c0] sm:$0xff]  ;;  %v219_v57 = vpack.c.bf16 %v123_v50, %v115_v49  ;;  %v122_v58 = vld [vmem:[#allocation2 + $0x1d0] sm:$0xff]  ;;  %v97_v59 = vld [vmem:[#allocation2 + $0x108] sm:$0xff] }
  0x2b   :  { %302 = vmatpush1.bf16.msra.mxu1 %v234_v39  ;;  %262 = vmatprep.subr.bf16.mxu0 %v225_v40  ;;  %v105_v60 = vld [vmem:[#allocation2 + $0x148] sm:$0xff]  ;;  %v99_v61 = vld [vmem:[#allocation2 + $0x118] sm:$0xff]  ;;  %v216_v63 = vpack.c.bf16 %v120_v55, %v112_v54  ;;  %v218_v1 = vpack.c.bf16 %v122_v58, %v114_v56  ;;  %v96_v3 = vld [vmem:[#allocation2 + $0x100] sm:$0xff] }
  0x2c   :  { %303 = vmatprep.subr.bf16.mxu1 %v227_v44  ;;  %v107_v62 = vld [vmem:[#allocation2 + $0x158] sm:$0xff]  ;;  %v209_v2 = vpack.c.bf16 %v105_v60, %v97_v59  ;;  %v104_v4 = vld [vmem:[#allocation2 + $0x140] sm:$0xff]  ;;  %v98_v5 = vld [vmem:[#allocation2 + $0x110] sm:$0xff] }
  0x2d   :  { %v211_v6 = vpack.c.bf16 %v107_v62, %v99_v61  ;;  %v106_v7 = vld [vmem:[#allocation2 + $0x150] sm:$0xff]  ;;  %v81_v8 = vld [vmem:[#allocation2 + $0x88] sm:$0xff]  ;;  %v83_v10 = vld [vmem:[#allocation2 + $0x98] sm:$0xff]  ;;  %v208_v12 = vpack.c.bf16 %v104_v4, %v96_v3 }
  0x2e   :  { %263 = vmatpush1.bf16.msra.mxu0 %v224_v51  ;;  %v89_v9 = vld [vmem:[#allocation2 + $0xc8] sm:$0xff]  ;;  %v91_v11 = vld [vmem:[#allocation2 + $0xd8] sm:$0xff]  ;;  %v210_v13 = vpack.c.bf16 %v106_v7, %v98_v5  ;;  %v80_v15 = vld [vmem:[#allocation2 + $0x80] sm:$0xff] }
  0x2f   :  { %304 = vmatpush1.bf16.msra.mxu1 %v226_v52  ;;  %264 = vmatprep.subr.bf16.mxu0 %v217_v53  ;;  %v201_v14 = vpack.c.bf16 %v89_v9, %v81_v8  ;;  %v88_v16 = vld [vmem:[#allocation2 + $0xc0] sm:$0xff]  ;;  %v82_v17 = vld [vmem:[#allocation2 + $0x90] sm:$0xff]  ;;  %v203_v18 = vpack.c.bf16 %v91_v11, %v83_v10  ;;  %v65_v20 = vld [vmem:[#allocation2 + $0x8] sm:$0xff] }
  0x30   :  { %305 = vmatprep.subr.bf16.mxu1 %v219_v57  ;;  %v90_v19 = vld [vmem:[#allocation2 + $0xd0] sm:$0xff]  ;;  %v73_v21 = vld [vmem:[#allocation2 + $0x48] sm:$0xff]  ;;  %v67_v22 = vld [vmem:[#allocation2 + $0x18] sm:$0xff]  ;;  %v200_v24 = vpack.c.bf16 %v88_v16, %v80_v15 }
  0x31   :  { %v75_v23 = vld [vmem:[#allocation2 + $0x58] sm:$0xff]  ;;  %v202_v25 = vpack.c.bf16 %v90_v19, %v82_v17  ;;  %v193_v26 = vpack.c.bf16 %v73_v21, %v65_v20  ;;  %v64_v27 = vld [vmem:[#allocation2] sm:$0xff]  ;;  %v66_v29 = vld [vmem:[#allocation2 + $0x10] sm:$0xff] }
  0x32   :  { %265 = vmatpush1.bf16.msra.mxu0 %v216_v63  ;;  %v72_v28 = vld [vmem:[#allocation2 + $0x40] sm:$0xff]  ;;  %v195_v30 = vpack.c.bf16 %v75_v23, %v67_v22  ;;  %v74_v31 = vld [vmem:[#allocation2 + $0x50] sm:$0xff]  ;;  %v181_v32 = vld [vmem:[#allocation2 + $0x3a8] sm:$0xff] }
  0x33   :  { %306 = vmatpush1.bf16.msra.mxu1 %v218_v1  ;;  %266 = vmatprep.subr.bf16.mxu0 %v209_v2  ;;  %v189_v33 = vld [vmem:[#allocation2 + $0x3e8] sm:$0xff]  ;;  %v183_v34 = vld [vmem:[#allocation2 + $0x3b8] sm:$0xff]  ;;  %v192_v36 = vpack.c.bf16 %v72_v28, %v64_v27  ;;  %v62_v37 = vld [vmem:[%s2057_s0] sm:$0xff]  ;;  %v194_v38 = vpack.c.bf16 %v74_v31, %v66_v29 }
  0x34   :  { %307 = vmatprep.subr.bf16.mxu1 %v211_v6  ;;  %v191_v35 = vld [vmem:[#allocation2 + $0x3f8] sm:$0xff]  ;;  %v253_v39 = vpack.c.bf16 %v189_v33, %v181_v32  ;;  %v180_v40 = vld [vmem:[#allocation2 + $0x3a0] sm:$0xff]  ;;  %v182_v42 = vld [vmem:[#allocation2 + $0x3b0] sm:$0xff]  ;;  %v1773_v47 = vpack.c.bf16 %v62_v37, %v62_v37 }
  0x35   :  { %v188_v41 = vld [vmem:[#allocation2 + $0x3e0] sm:$0xff]  ;;  %v255_v43 = vpack.c.bf16 %v191_v35, %v183_v34  ;;  %v190_v44 = vld [vmem:[#allocation2 + $0x3f0] sm:$0xff]  ;;  %v165_v45 = vld [vmem:[#allocation2 + $0x328] sm:$0xff] }
  0x36   :  { %267 = vmatpush1.bf16.msra.mxu0 %v208_v12  ;;  %v173_v46 = vld [vmem:[#allocation2 + $0x368] sm:$0xff]  ;;  %v167_v48 = vld [vmem:[#allocation2 + $0x338] sm:$0xff]  ;;  %v252_v50 = vpack.c.bf16 %v188_v41, %v180_v40  ;;  %v254_v51 = vpack.c.bf16 %v190_v44, %v182_v42  ;;  %v164_v53 = vld [vmem:[#allocation2 + $0x320] sm:$0xff] }
  0x37   :  { %308 = vmatpush1.bf16.msra.mxu1 %v210_v13  ;;  %268 = vmatprep.subr.bf16.mxu0 %v201_v14  ;;  %v175_v49 = vld [vmem:[#allocation2 + $0x378] sm:$0xff]  ;;  %v245_v52 = vpack.c.bf16 %v173_v46, %v165_v45  ;;  %v172_v54 = vld [vmem:[#allocation2 + $0x360] sm:$0xff]  ;;  %v166_v55 = vld [vmem:[#allocation2 + $0x330] sm:$0xff] }
  0x38   :  { %309 = vmatprep.subr.bf16.mxu1 %v203_v18  ;;  %v247_v56 = vpack.c.bf16 %v175_v49, %v167_v48  ;;  %v174_v57 = vld [vmem:[#allocation2 + $0x370] sm:$0xff]  ;;  %v149_v58 = vld [vmem:[#allocation2 + $0x2a8] sm:$0xff]  ;;  %v151_v60 = vld [vmem:[#allocation2 + $0x2b8] sm:$0xff]  ;;  %v244_v62 = vpack.c.bf16 %v172_v54, %v164_v53 }
  0x39   :  { %v157_v59 = vld [vmem:[#allocation2 + $0x2e8] sm:$0xff]  ;;  %v159_v61 = vld [vmem:[#allocation2 + $0x2f8] sm:$0xff]  ;;  %v246_v63 = vpack.c.bf16 %v174_v57, %v166_v55  ;;  %v148_v2 = vld [vmem:[#allocation2 + $0x2a0] sm:$0xff] }
  0x3a   :  { %269 = vmatpush1.bf16.msra.mxu0 %v200_v24  ;;  %v237_v1 = vpack.c.bf16 %v157_v59, %v149_v58  ;;  %v156_v3 = vld [vmem:[#allocation2 + $0x2e0] sm:$0xff]  ;;  %v150_v4 = vld [vmem:[#allocation2 + $0x2b0] sm:$0xff]  ;;  %v239_v5 = vpack.c.bf16 %v159_v61, %v151_v60  ;;  %v133_v7 = vld [vmem:[#allocation2 + $0x228] sm:$0xff] }
  0x3b   :  { %310 = vmatpush1.bf16.msra.mxu1 %v202_v25  ;;  %270 = vmatprep.subr.bf16.mxu0 %v193_v26  ;;  %v158_v6 = vld [vmem:[#allocation2 + $0x2f0] sm:$0xff]  ;;  %v141_v8 = vld [vmem:[#allocation2 + $0x268] sm:$0xff]  ;;  %v135_v9 = vld [vmem:[#allocation2 + $0x238] sm:$0xff]  ;;  %v236_v11 = vpack.c.bf16 %v156_v3, %v148_v2 }
  0x3c   :  { %311 = vmatprep.subr.bf16.mxu1 %v195_v30  ;;  %v143_v10 = vld [vmem:[#allocation2 + $0x278] sm:$0xff]  ;;  %v238_v12 = vpack.c.bf16 %v158_v6, %v150_v4  ;;  %v229_v13 = vpack.c.bf16 %v141_v8, %v133_v7  ;;  %v132_v14 = vld [vmem:[#allocation2 + $0x220] sm:$0xff]  ;;  %v134_v16 = vld [vmem:[#allocation2 + $0x230] sm:$0xff] }
  0x3d   :  { %v140_v15 = vld [vmem:[#allocation2 + $0x260] sm:$0xff]  ;;  %v231_v17 = vpack.c.bf16 %v143_v10, %v135_v9  ;;  %v142_v18 = vld [vmem:[#allocation2 + $0x270] sm:$0xff]  ;;  %v117_v19 = vld [vmem:[#allocation2 + $0x1a8] sm:$0xff] }
  0x3e   :  { %271 = vmatpush1.bf16.msra.mxu0 %v192_v36  ;;  %v125_v20 = vld [vmem:[#allocation2 + $0x1e8] sm:$0xff]  ;;  %v119_v21 = vld [vmem:[#allocation2 + $0x1b8] sm:$0xff]  ;;  %v228_v23 = vpack.c.bf16 %v140_v15, %v132_v14  ;;  %v116_v25 = vld [vmem:[#allocation2 + $0x1a0] sm:$0xff] }
  0x3f   :  { %312 = vmatpush1.bf16.msra.mxu1 %v194_v38  ;;  %338 = vmatprep.subr.bf16.mxu0 %v253_v39  ;;  %v127_v22 = vld [vmem:[#allocation2 + $0x1f8] sm:$0xff]  ;;  %v221_v24 = vpack.c.bf16 %v125_v20, %v117_v19  ;;  %v124_v26 = vld [vmem:[#allocation2 + $0x1e0] sm:$0xff]  ;;  %v118_v27 = vld [vmem:[#allocation2 + $0x1b0] sm:$0xff] }
  0x40   :  { %379 = vmatprep.subr.bf16.mxu1 %v255_v43  ;;  %v223_v28 = vpack.c.bf16 %v127_v22, %v119_v21  ;;  %v126_v29 = vld [vmem:[#allocation2 + $0x1f0] sm:$0xff]  ;;  %v101_v30 = vld [vmem:[#allocation2 + $0x128] sm:$0xff]  ;;  %v103_v32 = vld [vmem:[#allocation2 + $0x138] sm:$0xff]  ;;  %v220_v34 = vpack.c.bf16 %v124_v26, %v116_v25 }
  0x41   :  { %289 = vmatmul.mubr.bf16.vlgmr.msra.gmra.mxu0 %v1773_v47  ;;  %v109_v31 = vld [vmem:[#allocation2 + $0x168] sm:$0xff]  ;;  %v111_v33 = vld [vmem:[#allocation2 + $0x178] sm:$0xff]  ;;  %v222_v35 = vpack.c.bf16 %v126_v29, %v118_v27  ;;  %v100_v37 = vld [vmem:[#allocation2 + $0x120] sm:$0xff] }
  0x42   :  { %330 = vmatmul.mubr.bf16.vlgmr.msra.gmra.mxu1 %v1773_v47  ;;  %339 = vmatpush1.bf16.msra.mxu0 %v252_v50  ;;  %v213_v36 = vpack.c.bf16 %v109_v31, %v101_v30  ;;  %v108_v38 = vld [vmem:[#allocation2 + $0x160] sm:$0xff]  ;;  %v102_v39 = vld [vmem:[#allocation2 + $0x130] sm:$0xff]  ;;  %v215_v40 = vpack.c.bf16 %v111_v33, %v103_v32  ;;  %v85_v42 = vld [vmem:[#allocation2 + $0xa8] sm:$0xff] }
  0x43   :  { %380 = vmatpush1.bf16.msra.mxu1 %v254_v51  ;;  %340 = vmatprep.subr.bf16.mxu0 %v245_v52  ;;  %v110_v41 = vld [vmem:[#allocation2 + $0x170] sm:$0xff]  ;;  %v93_v43 = vld [vmem:[#allocation2 + $0xe8] sm:$0xff]  ;;  %v87_v44 = vld [vmem:[#allocation2 + $0xb8] sm:$0xff]  ;;  %v212_v46 = vpack.c.bf16 %v108_v38, %v100_v37 }
  0x44   :  { %381 = vmatprep.subr.bf16.mxu1 %v247_v56  ;;  %370 = vmatprep.mubr.bf16.mxu0 %v1709_v0  ;;  %v95_v45 = vld [vmem:[#allocation2 + $0xf8] sm:$0xff]  ;;  %v214_v48 = vpack.c.bf16 %v110_v41, %v102_v39  ;;  %v205_v49 = vpack.c.bf16 %v93_v43, %v85_v42  ;;  %v84_v50 = vld [vmem:[#allocation2 + $0xa0] sm:$0xff]  ;;  %v86_v52 = vld [vmem:[#allocation2 + $0xb0] sm:$0xff] }
  0x45   :  { %411 = vmatprep.mubr.bf16.mxu1 %v1709_v0  ;;  %v230_v0 = vpack.c.bf16 %v142_v18, %v134_v16  ;;  %v92_v51 = vld [vmem:[#allocation2 + $0xe0] sm:$0xff]  ;;  %v207_v53 = vpack.c.bf16 %v95_v45, %v87_v44  ;;  %v94_v54 = vld [vmem:[#allocation2 + $0xf0] sm:$0xff]  ;;  %v69_v55 = vld [vmem:[#allocation2 + $0x28] sm:$0xff] }
  0x46   :  { %341 = vmatpush1.bf16.msra.mxu0 %v244_v62  ;;  %v77_v56 = vld [vmem:[#allocation2 + $0x68] sm:$0xff]  ;;  %v71_v57 = vld [vmem:[#allocation2 + $0x38] sm:$0xff]  ;;  %v204_v59 = vpack.c.bf16 %v92_v51, %v84_v50  ;;  %v206_v60 = vpack.c.bf16 %v94_v54, %v86_v52  ;;  %v68_v62 = vld [vmem:[#allocation2 + $0x20] sm:$0xff] }
  0x47   :  { %382 = vmatpush1.bf16.msra.mxu1 %v246_v63  ;;  %342 = vmatprep.subr.bf16.mxu0 %v237_v1  ;;  %v79_v58 = vld [vmem:[#allocation2 + $0x78] sm:$0xff]  ;;  %v197_v61 = vpack.c.bf16 %v77_v56, %v69_v55  ;;  %v76_v63 = vld [vmem:[#allocation2 + $0x60] sm:$0xff]  ;;  %v70_v2 = vld [vmem:[#allocation2 + $0x30] sm:$0xff] }
  0x48   :  { %383 = vmatprep.subr.bf16.mxu1 %v239_v5  ;;  %v199_v1 = vpack.c.bf16 %v79_v58, %v71_v57  ;;  %v78_v3 = vld [vmem:[#allocation2 + $0x70] sm:$0xff]  ;;  %v196_v4 = vpack.c.bf16 %v76_v63, %v68_v62  ;;  %v843_v6 = vld [vmem:[#allocation5 + $0xe8] sm:$0xff]  ;;  %v845_v7 = vld [vmem:[#allocation5 + $0xf8] sm:$0xff] }
  0x49   :  { %v198_v5 = vpack.c.bf16 %v78_v3, %v70_v2  ;;  %v907_v8 = vld [vmem:[#allocation5 + $0x2e8] sm:$0xff]  ;;  %v1085_v9 = vpack.c.bf16 %v845_v7, %v843_v6  ;;  %v909_v10 = vld [vmem:[#allocation5 + $0x2f8] sm:$0xff]  ;;  %v906_v15 = vld [vmem:[#allocation5 + $0x2e0] sm:$0xff] }
  0x4a   :  { %343 = vmatpush1.bf16.msra.mxu0 %v236_v11  ;;  %v842_v11 = vld [vmem:[#allocation5 + $0xe0] sm:$0xff]  ;;  %v908_v16 = vld [vmem:[#allocation5 + $0x2f0] sm:$0xff]  ;;  %v839_v18 = vld [vmem:[#allocation5 + $0xc8] sm:$0xff] }
  0x4b   :  { %384 = vmatpush1.bf16.msra.mxu1 %v238_v12  ;;  %344 = vmatprep.subr.bf16.mxu0 %v229_v13  ;;  %v844_v12 = vld [vmem:[#allocation5 + $0xf0] sm:$0xff]  ;;  %v1117_v13 = vpack.c.bf16 %v909_v10, %v907_v8  ;;  %v841_v19 = vld [vmem:[#allocation5 + $0xd8] sm:$0xff]  ;;  %v903_v20 = vld [vmem:[#allocation5 + $0x2c8] sm:$0xff] }
  0x4c   :  { %385 = vmatprep.subr.bf16.mxu1 %v231_v17  ;;  %v1084_v14 = vpack.c.bf16 %v844_v12, %v842_v11  ;;  %v1116_v17 = vpack.c.bf16 %v908_v16, %v906_v15  ;;  %v905_v21 = vld [vmem:[#allocation5 + $0x2d8] sm:$0xff]  ;;  %v838_v22 = vld [vmem:[#allocation5 + $0xc0] sm:$0xff]  ;;  %v904_v26 = vld [vmem:[#allocation5 + $0x2d0] sm:$0xff] }
  0x4d   :  { %v902_v25 = vld [vmem:[#allocation5 + $0x2c0] sm:$0xff]  ;;  %v837_v29 = vld [vmem:[#allocation5 + $0xb8] sm:$0xff]  ;;  %v899_v30 = vld [vmem:[#allocation5 + $0x2a8] sm:$0xff] }
  0x4e   :  { %345 = vmatpush1.bf16.msra.mxu0 %v228_v23  ;;  %v840_v23 = vld [vmem:[#allocation5 + $0xd0] sm:$0xff]  ;;  %v1114_v27 = vpack.c.bf16 %v904_v26, %v902_v25  ;;  %v901_v32 = vld [vmem:[#allocation5 + $0x2b8] sm:$0xff]  ;;  %v834_v33 = vld [vmem:[#allocation5 + $0xa0] sm:$0xff] }
  0x4f   :  { %386 = vmatpush1.bf16.msra.mxu1 %v230_v0  ;;  %346 = vmatprep.subr.bf16.mxu0 %v221_v24  ;;  %v1115_v0 = vpack.c.bf16 %v905_v21, %v903_v20  ;;  %v1082_v24 = vpack.c.bf16 %v840_v23, %v838_v22  ;;  %v898_v37 = vld [vmem:[#allocation5 + $0x2a0] sm:$0xff]  ;;  %v900_v38 = vld [vmem:[#allocation5 + $0x2b0] sm:$0xff]  ;;  %v833_v41 = vld [vmem:[#allocation5 + $0x98] sm:$0xff] }
  0x50   :  { %387 = vmatprep.subr.bf16.mxu1 %v223_v28  ;;  %v835_v28 = vld [vmem:[#allocation5 + $0xa8] sm:$0xff]  ;;  %v1112_v39 = vpack.c.bf16 %v900_v38, %v898_v37  ;;  %v897_v44 = vld [vmem:[#allocation5 + $0x298] sm:$0xff]  ;;  %v830_v45 = vld [vmem:[#allocation5 + $0x80] sm:$0xff] }
  0x51   :  { %v1081_v31 = vpack.c.bf16 %v837_v29, %v835_v28  ;;  %v895_v42 = vld [vmem:[#allocation5 + $0x288] sm:$0xff]  ;;  %v894_v50 = vld [vmem:[#allocation5 + $0x280] sm:$0xff]  ;;  %v896_v51 = vld [vmem:[#allocation5 + $0x290] sm:$0xff] }
  0x52   :  { %347 = vmatpush1.bf16.msra.mxu0 %v220_v34  ;;  %v836_v34 = vld [vmem:[#allocation5 + $0xb0] sm:$0xff]  ;;  %v1110_v52 = vpack.c.bf16 %v896_v51, %v894_v50  ;;  %v829_v54 = vld [vmem:[#allocation5 + $0x78] sm:$0xff]  ;;  %v891_v55 = vld [vmem:[#allocation5 + $0x268] sm:$0xff] }
  0x53   :  { %388 = vmatpush1.bf16.msra.mxu1 %v222_v35  ;;  %348 = vmatprep.subr.bf16.mxu0 %v213_v36  ;;  %v1113_v35 = vpack.c.bf16 %v901_v32, %v899_v30  ;;  %v1080_v36 = vpack.c.bf16 %v836_v34, %v834_v33  ;;  %v893_v57 = vld [vmem:[#allocation5 + $0x278] sm:$0xff]  ;;  %v826_v58 = vld [vmem:[#allocation5 + $0x60] sm:$0xff]  ;;  %v892_v63 = vld [vmem:[#allocation5 + $0x270] sm:$0xff] }
  0x54   :  { %389 = vmatprep.subr.bf16.mxu1 %v215_v40  ;;  %v831_v40 = vld [vmem:[#allocation5 + $0x88] sm:$0xff]  ;;  %v890_v62 = vld [vmem:[#allocation5 + $0x260] sm:$0xff]  ;;  %v825_v3 = vld [vmem:[#allocation5 + $0x58] sm:$0xff] }
  0x55   :  { %v1079_v43 = vpack.c.bf16 %v833_v41, %v831_v40  ;;  %v823_v2 = vld [vmem:[#allocation5 + $0x48] sm:$0xff]  ;;  %v889_v6 = vld [vmem:[#allocation5 + $0x258] sm:$0xff]  ;;  %v822_v7 = vld [vmem:[#allocation5 + $0x40] sm:$0xff] }
  0x56   :  { %349 = vmatpush1.bf16.msra.mxu0 %v212_v46  ;;  %v832_v46 = vld [vmem:[#allocation5 + $0x90] sm:$0xff]  ;;  %v886_v11 = vld [vmem:[#allocation5 + $0x240] sm:$0xff]  ;;  %v821_v15 = vld [vmem:[#allocation5 + $0x38] sm:$0xff] }
  0x57   :  { %390 = vmatpush1.bf16.msra.mxu1 %v214_v48  ;;  %350 = vmatprep.subr.bf16.mxu0 %v205_v49  ;;  %v1111_v48 = vpack.c.bf16 %v897_v44, %v895_v42  ;;  %v1078_v49 = vpack.c.bf16 %v832_v46, %v830_v45  ;;  %v824_v8 = vld [vmem:[#allocation5 + $0x50] sm:$0xff]  ;;  %v882_v21 = vld [vmem:[#allocation5 + $0x220] sm:$0xff]  ;;  %v817_v25 = vld [vmem:[#allocation5 + $0x18] sm:$0xff] }
  0x58   :  { %391 = vmatprep.subr.bf16.mxu1 %v207_v53  ;;  %v827_v53 = vld [vmem:[#allocation5 + $0x68] sm:$0xff]  ;;  %v1074_v10 = vpack.c.bf16 %v824_v8, %v822_v7  ;;  %v888_v12 = vld [vmem:[#allocation5 + $0x250] sm:$0xff]  ;;  %v881_v28 = vld [vmem:[#allocation5 + $0x218] sm:$0xff] }
  0x59   :  { %v1077_v56 = vpack.c.bf16 %v829_v54, %v827_v53  ;;  %v884_v22 = vld [vmem:[#allocation5 + $0x230] sm:$0xff]  ;;  %v879_v26 = vld [vmem:[#allocation5 + $0x208] sm:$0xff]  ;;  %v814_v29 = vld [vmem:[#allocation5] sm:$0xff] }
  0x5a   :  { %351 = vmatpush1.bf16.msra.mxu0 %v204_v59  ;;  %v828_v59 = vld [vmem:[#allocation5 + $0x70] sm:$0xff]  ;;  %v878_v33 = vld [vmem:[#allocation5 + $0x200] sm:$0xff]  ;;  %v877_v37 = vld [vmem:[#allocation5 + $0x1f8] sm:$0xff] }
  0x5b   :  { %392 = vmatpush1.bf16.msra.mxu1 %v206_v60  ;;  %352 = vmatprep.subr.bf16.mxu0 %v197_v61  ;;  %v1109_v60 = vpack.c.bf16 %v893_v57, %v891_v55  ;;  %v1076_v61 = vpack.c.bf16 %v828_v59, %v826_v58  ;;  %v816_v30 = vld [vmem:[#allocation5 + $0x10] sm:$0xff]  ;;  %v939_v38 = vld [vmem:[#allocation5 + $0x3e8] sm:$0xff]  ;;  %v941_v40 = vld [vmem:[#allocation5 + $0x3f8] sm:$0xff] }
  0x5c   :  { %393 = vmatprep.subr.bf16.mxu1 %v199_v1  ;;  %v1108_v1 = vpack.c.bf16 %v892_v63, %v890_v62  ;;  %v1070_v32 = vpack.c.bf16 %v816_v30, %v814_v29  ;;  %v880_v34 = vld [vmem:[#allocation5 + $0x210] sm:$0xff]  ;;  %v874_v41 = vld [vmem:[#allocation5 + $0x1e0] sm:$0xff]  ;;  %v873_v50 = vld [vmem:[#allocation5 + $0x1d8] sm:$0xff] }
  0x5d   :  { %v876_v42 = vld [vmem:[#allocation5 + $0x1f0] sm:$0xff]  ;;  %v938_v45 = vld [vmem:[#allocation5 + $0x3e0] sm:$0xff]  ;;  %v935_v51 = vld [vmem:[#allocation5 + $0x3c8] sm:$0xff] }
  0x5e   :  { %353 = vmatpush1.bf16.msra.mxu0 %v196_v4  ;;  %v887_v4 = vld [vmem:[#allocation5 + $0x248] sm:$0xff]  ;;  %v1100_v44 = vpack.c.bf16 %v876_v42, %v874_v41  ;;  %v940_v46 = vld [vmem:[#allocation5 + $0x3f0] sm:$0xff]  ;;  %v937_v53 = vld [vmem:[#allocation5 + $0x3d8] sm:$0xff] }
  0x5f   :  { %394 = vmatpush1.bf16.msra.mxu1 %v198_v5  ;;  %1198 = vmatprep.subr.bf16.mxu0 %v1085_v9  ;;  %v1075_v5 = vpack.c.bf16 %v825_v3, %v823_v2  ;;  %v1107_v9 = vpack.c.bf16 %v889_v6, %v887_v4  ;;  %v870_v54 = vld [vmem:[#allocation5 + $0x1c0] sm:$0xff]  ;;  %v872_v55 = vld [vmem:[#allocation5 + $0x1d0] sm:$0xff]  ;;  %v869_v62 = vld [vmem:[#allocation5 + $0x1b8] sm:$0xff] }
  0x60   :  { %1239 = vmatprep.subr.bf16.mxu1 %v1117_v13  ;;  %v1106_v13 = vpack.c.bf16 %v888_v12, %v886_v11  ;;  %v1098_v57 = vpack.c.bf16 %v872_v55, %v870_v54  ;;  %v934_v58 = vld [vmem:[#allocation5 + $0x3c0] sm:$0xff]  ;;  %v936_v59 = vld [vmem:[#allocation5 + $0x3d0] sm:$0xff]  ;;  %v933_v2 = vld [vmem:[#allocation5 + $0x3b8] sm:$0xff] }
  0x61   :  { %371 = vmatmul.mubr.bf16.vlgmr.msra.gmra.mxu0 %v1773_v47  ;;  %v866_v3 = vld [vmem:[#allocation5 + $0x1a0] sm:$0xff]  ;;  %v932_v7 = vld [vmem:[#allocation5 + $0x3b0] sm:$0xff]  ;;  %v865_v11 = vld [vmem:[#allocation5 + $0x198] sm:$0xff] }
  0x62   :  { %412 = vmatmul.mubr.bf16.vlgmr.msra.gmra.mxu1 %v1773_v47  ;;  %1199 = vmatpush1.bf16.msra.mxu0 %v1084_v14  ;;  %v1083_v47 = vpack.c.bf16 %v841_v19, %v839_v18  ;;  %v819_v14 = vld [vmem:[#allocation5 + $0x28] sm:$0xff]  ;;  %v885_v18 = vld [vmem:[#allocation5 + $0x238] sm:$0xff]  ;;  %v818_v19 = vld [vmem:[#allocation5 + $0x20] sm:$0xff] }
  0x63   :  { %1240 = vmatpush1.bf16.msra.mxu1 %v1116_v17  ;;  %v1073_v16 = vpack.c.bf16 %v821_v15, %v819_v14  ;;  %v883_v17 = vld [vmem:[#allocation5 + $0x228] sm:$0xff]  ;;  %v930_v6 = vld [vmem:[#allocation5 + $0x3a0] sm:$0xff]  ;;  %v929_v14 = vld [vmem:[#allocation5 + $0x398] sm:$0xff] }
  0x64   :  { %1200 = vmatprep.subr.bf16.mxu0 %v1083_v47  ;;  %1241 = vmatprep.subr.bf16.mxu1 %v1115_v0  ;;  %v1105_v20 = vpack.c.bf16 %v885_v18, %v883_v17  ;;  %v820_v47 = vld [vmem:[#allocation5 + $0x30] sm:$0xff]  ;;  %v1104_v0 = vpack.c.bf16 %v884_v22, %v882_v21  ;;  %v927_v12 = vld [vmem:[#allocation5 + $0x388] sm:$0xff]  ;;  %v862_v15 = vld [vmem:[#allocation5 + $0x180] sm:$0xff] }
  0x65   :  { %v1072_v23 = vpack.c.bf16 %v820_v47, %v818_v19  ;;  %v1127_v17 = vpack.c.bf16 %v929_v14, %v927_v12  ;;  %v926_v19 = vld [vmem:[#allocation5 + $0x380] sm:$0xff]  ;;  %v859_v21 = vld [vmem:[#allocation5 + $0x168] sm:$0xff]  ;;  %v861_v22 = vld [vmem:[#allocation5 + $0x178] sm:$0xff] }
  0x66   :  { %1201 = vmatpush1.bf16.msra.mxu0 %v1082_v24  ;;  %v815_v24 = vld [vmem:[#allocation5 + $0x8] sm:$0xff]  ;;  %v922_v29 = vld [vmem:[#allocation5 + $0x360] sm:$0xff]  ;;  %v924_v30 = vld [vmem:[#allocation5 + $0x370] sm:$0xff] }
  0x67   :  { %1242 = vmatpush1.bf16.msra.mxu1 %v1114_v27  ;;  %1202 = vmatprep.subr.bf16.mxu0 %v1081_v31  ;;  %v1071_v27 = vpack.c.bf16 %v817_v25, %v815_v24  ;;  %v1103_v31 = vpack.c.bf16 %v881_v28, %v879_v26  ;;  %v925_v24 = vld [vmem:[#allocation5 + $0x378] sm:$0xff]  ;;  %v858_v25 = vld [vmem:[#allocation5 + $0x160] sm:$0xff]  ;;  %v860_v26 = vld [vmem:[#allocation5 + $0x170] sm:$0xff] }
  0x68   :  { %1243 = vmatprep.subr.bf16.mxu1 %v1113_v35  ;;  %v1102_v35 = vpack.c.bf16 %v880_v34, %v878_v33  ;;  %v1092_v28 = vpack.c.bf16 %v860_v26, %v858_v25  ;;  %v857_v33 = vld [vmem:[#allocation5 + $0x158] sm:$0xff]  ;;  %v919_v34 = vld [vmem:[#allocation5 + $0x348] sm:$0xff]  ;;  %v918_v41 = vld [vmem:[#allocation5 + $0x340] sm:$0xff] }
  0x69   :  { %v920_v42 = vld [vmem:[#allocation5 + $0x350] sm:$0xff] }
  0x6a   :  { %1203 = vmatpush1.bf16.msra.mxu0 %v1080_v36  ;;  %v875_v36 = vld [vmem:[#allocation5 + $0x1e8] sm:$0xff]  ;;  %v916_v55 = vld [vmem:[#allocation5 + $0x330] sm:$0xff] }
  0x6b   :  { %1244 = vmatpush1.bf16.msra.mxu1 %v1112_v39  ;;  %1204 = vmatprep.subr.bf16.mxu0 %v1079_v43  ;;  %v1101_v39 = vpack.c.bf16 %v877_v37, %v875_v36  ;;  %v1133_v43 = vpack.c.bf16 %v941_v40, %v939_v38  ;;  %v921_v36 = vld [vmem:[#allocation5 + $0x358] sm:$0xff]  ;;  %v854_v37 = vld [vmem:[#allocation5 + $0x140] sm:$0xff]  ;;  %v856_v38 = vld [vmem:[#allocation5 + $0x150] sm:$0xff] }
  0x6c   :  { %1245 = vmatprep.subr.bf16.mxu1 %v1111_v48  ;;  %v1132_v48 = vpack.c.bf16 %v940_v46, %v938_v45  ;;  %v1090_v40 = vpack.c.bf16 %v856_v38, %v854_v37  ;;  %v853_v45 = vld [vmem:[#allocation5 + $0x138] sm:$0xff]  ;;  %v915_v46 = vld [vmem:[#allocation5 + $0x328] sm:$0xff] }
  0x6e   :  { %1205 = vmatpush1.bf16.msra.mxu0 %v1078_v49  ;;  %v871_v49 = vld [vmem:[#allocation5 + $0x1c8] sm:$0xff] }
  0x6f   :  { %1246 = vmatpush1.bf16.msra.mxu1 %v1110_v52  ;;  %1206 = vmatprep.subr.bf16.mxu0 %v1077_v56  ;;  %v1099_v52 = vpack.c.bf16 %v873_v50, %v871_v49  ;;  %v1131_v56 = vpack.c.bf16 %v937_v53, %v935_v51  ;;  %v850_v51 = vld [vmem:[#allocation5 + $0x120] sm:$0xff] }
  0x70   :  { %1247 = vmatprep.subr.bf16.mxu1 %v1109_v60  ;;  %v1130_v60 = vpack.c.bf16 %v936_v59, %v934_v58  ;;  %v914_v53 = vld [vmem:[#allocation5 + $0x320] sm:$0xff] }
  0x71   :  { %v1120_v58 = vpack.c.bf16 %v916_v55, %v914_v53 }
  0x72   :  { %1207 = vmatpush1.bf16.msra.mxu0 %v1076_v61  ;;  %v867_v61 = vld [vmem:[#allocation5 + $0x1a8] sm:$0xff] }
  0x73   :  { %1248 = vmatpush1.bf16.msra.mxu1 %v1108_v1  ;;  %1208 = vmatprep.subr.bf16.mxu0 %v1075_v5  ;;  %v1097_v63 = vpack.c.bf16 %v869_v62, %v867_v61  ;;  %v931_v1 = vld [vmem:[#allocation5 + $0x3a8] sm:$0xff]  ;;  %v868_v5 = vld [vmem:[#allocation5 + $0x1b0] sm:$0xff]  ;;  %v913_v61 = vld [vmem:[#allocation5 + $0x318] sm:$0xff] }
  0x74   :  { %1249 = vmatprep.subr.bf16.mxu1 %v1107_v9  ;;  %v1129_v4 = vpack.c.bf16 %v933_v2, %v931_v1  ;;  %v1096_v8 = vpack.c.bf16 %v868_v5, %v866_v3  ;;  %v1128_v9 = vpack.c.bf16 %v932_v7, %v930_v6  ;;  %v846_v62 = vld [vmem:[#allocation5 + $0x100] sm:$0xff]  ;;  %v848_v1 = vld [vmem:[#allocation5 + $0x110] sm:$0xff]  ;;  %v971_v6 = vld [vmem:[#allocation5 + $0x4e8] sm:$0xff] }
  0x75   :  { %v910_v2 = vld [vmem:[#allocation5 + $0x300] sm:$0xff]  ;;  %v912_v3 = vld [vmem:[#allocation5 + $0x310] sm:$0xff]  ;;  %v973_v7 = vld [vmem:[#allocation5 + $0x4f8] sm:$0xff] }
  0x76   :  { %1209 = vmatpush1.bf16.msra.mxu0 %v1074_v10  ;;  %v863_v10 = vld [vmem:[#allocation5 + $0x188] sm:$0xff]  ;;  %v1118_v5 = vpack.c.bf16 %v912_v3, %v910_v2 }
  0x77   :  { %1250 = vmatpush1.bf16.msra.mxu1 %v1106_v13  ;;  %1210 = vmatprep.subr.bf16.mxu0 %v1073_v16  ;;  %v1095_v13 = vpack.c.bf16 %v865_v11, %v863_v10  ;;  %v864_v16 = vld [vmem:[#allocation5 + $0x190] sm:$0xff]  ;;  %v1037_v10 = vld [vmem:[#allocation5 + $0x6f8] sm:$0xff] }
  0x78   :  { %1251 = vmatprep.subr.bf16.mxu1 %v1105_v20  ;;  %v1094_v18 = vpack.c.bf16 %v864_v16, %v862_v15  ;;  %v928_v20 = vld [vmem:[#allocation5 + $0x390] sm:$0xff] }
  0x79   :  { %v1126_v47 = vpack.c.bf16 %v928_v20, %v926_v19 }
  0x7a   :  { %1211 = vmatpush1.bf16.msra.mxu0 %v1072_v23  ;;  %v923_v23 = vld [vmem:[#allocation5 + $0x368] sm:$0xff] }
  0x7b   :  { %1252 = vmatpush1.bf16.msra.mxu1 %v1104_v0  ;;  %1212 = vmatprep.subr.bf16.mxu0 %v1071_v27  ;;  %v1093_v0 = vpack.c.bf16 %v861_v22, %v859_v21  ;;  %v1125_v27 = vpack.c.bf16 %v925_v24, %v923_v23 }
  0x7c   :  { %1253 = vmatprep.subr.bf16.mxu1 %v1103_v31  ;;  %v1124_v31 = vpack.c.bf16 %v924_v30, %v922_v29 }
  0x7e   :  { %1213 = vmatpush1.bf16.msra.mxu0 %v1070_v32  ;;  %v855_v32 = vld [vmem:[#allocation5 + $0x148] sm:$0xff] }
  0x7f   :  { %1254 = vmatpush1.bf16.msra.mxu1 %v1102_v35  ;;  %1214 = vmatprep.subr.bf16.mxu0 %v1101_v39  ;;  %v1091_v35 = vpack.c.bf16 %v857_v33, %v855_v32  ;;  %v1123_v39 = vpack.c.bf16 %v921_v36, %v919_v34 }
  0x80   :  { %1255 = vmatprep.subr.bf16.mxu1 %v1133_v43  ;;  %v851_v43 = vld [vmem:[#allocation5 + $0x128] sm:$0xff] }
  0x81   :  { %v1089_v49 = vpack.c.bf16 %v853_v45, %v851_v43 }
  0x82   :  { %1215 = vmatpush2.bf16.msra.mxu0 %v1100_v44  ;;  %v1122_v44 = vpack.c.bf16 %v920_v42, %v918_v41 }
  0x83   :  { %1256 = vmatpush2.bf16.msra.mxu1 %v1132_v48  ;;  %1216 = vmatprep.subr.bf16.mxu0 %v1099_v52  ;;  %v917_v48 = vld [vmem:[#allocation5 + $0x338] sm:$0xff]  ;;  %v852_v52 = vld [vmem:[#allocation5 + $0x130] sm:$0xff] }
  0x84   :  { %1257 = vmatprep.subr.bf16.mxu1 %v1131_v56  ;;  %v1121_v50 = vpack.c.bf16 %v917_v48, %v915_v46  ;;  %v1088_v54 = vpack.c.bf16 %v852_v52, %v850_v51  ;;  %v847_v56 = vld [vmem:[#allocation5 + $0x108] sm:$0xff] }
  0x86   :  { %1217 = vmatpush2.bf16.msra.mxu0 %v1098_v57  ;;  %v849_v57 = vld [vmem:[#allocation5 + $0x118] sm:$0xff] }
  0x87   :  { %1258 = vmatpush2.bf16.msra.mxu1 %v1130_v60  ;;  %1218 = vmatprep.subr.bf16.mxu0 %v1097_v63  ;;  %v1087_v59 = vpack.c.bf16 %v849_v57, %v847_v56  ;;  %v911_v60 = vld [vmem:[#allocation5 + $0x308] sm:$0xff] }
  0x88   :  { %1259 = vmatprep.subr.bf16.mxu1 %v1129_v4  ;;  %v1119_v63 = vpack.c.bf16 %v913_v61, %v911_v60  ;;  %v1086_v4 = vpack.c.bf16 %v848_v1, %v846_v62 }
  0x8a   :  { %1219 = vmatpush2.bf16.msra.mxu0 %v1096_v8  ;;  %v1035_v8 = vld [vmem:[#allocation5 + $0x6e8] sm:$0xff] }
  0x8b   :  { %1260 = vmatpush2.bf16.msra.mxu1 %v1128_v9  ;;  %1220 = vmatprep.subr.bf16.mxu0 %v1095_v13  ;;  %v1149_v9 = vpack.c.bf16 %v973_v7, %v971_v6  ;;  %v1181_v11 = vpack.c.bf16 %v1037_v10, %v1035_v8 }
  0x8c   :  { %1261 = vmatprep.subr.bf16.mxu1 %v1127_v17 }
  0x8e   :  { %1221 = vmatpush2.bf16.msra.mxu0 %v1094_v18 }
  0x8f   :  { %1262 = vmatpush2.bf16.msra.mxu1 %v1126_v47  ;;  %1222 = vmatprep.subr.bf16.mxu0 %v1093_v0 }
  0x90   :  { %1263 = vmatprep.subr.bf16.mxu1 %v1125_v27 }
  0x92   :  { %1223 = vmatpush2.bf16.msra.mxu0 %v1092_v28 }
  0x93   :  { %1264 = vmatpush2.bf16.msra.mxu1 %v1124_v31  ;;  %1224 = vmatprep.subr.bf16.mxu0 %v1091_v35 }
  0x94   :  { %1265 = vmatprep.subr.bf16.mxu1 %v1123_v39 }
  0x96   :  { %1225 = vmatpush2.bf16.msra.mxu0 %v1090_v40 }
  0x97   :  { %1266 = vmatpush2.bf16.msra.mxu1 %v1122_v44  ;;  %1226 = vmatprep.subr.bf16.mxu0 %v1089_v49 }
  0x98   :  { %1267 = vmatprep.subr.bf16.mxu1 %v1121_v50 }
  0x9a   :  { %1227 = vmatpush2.bf16.msra.mxu0 %v1088_v54 }
  0x9b   :  { %1268 = vmatpush2.bf16.msra.mxu1 %v1120_v58  ;;  %1228 = vmatprep.subr.bf16.mxu0 %v1087_v59 }
  0x9c   :  { %1269 = vmatprep.subr.bf16.mxu1 %v1119_v63 }
  0x9e   :  { %1229 = vmatpush2.bf16.msra.mxu0 %v1086_v4 }
  0x9f   :  { %1270 = vmatpush2.bf16.msra.mxu1 %v1118_v5  ;;  %1280 = vmatprep.subr.bf16.mxu0 %v1149_v9 }
  0xa0   :  { %1321 = vmatprep.subr.bf16.mxu1 %v1181_v11 }
 0x101   :  { %v1781_v12 = vpop.f32.mrf.mxu0 }
 0x102   :  { %v1783_v13 = vpop.f32.mrf.mxu1  ;;  %v422_v16 = vrot.slane %v1781_v12, 4  ;;  %v470_v17 = vmul.f32 %v1781_v12, %v1781_v12 }
 0x103   :  { %v1785_v14 = vpop.f32.mrf.mxu0  ;;  %v472_v19 = vmul.f32 %v1783_v13, %v1783_v13  ;;  %v434_v47 = vrot.slane %v1783_v13, 4 }
 0x104   :  { %v1787_v15 = vpop.f32.mrf.mxu1  ;;  %v423_v23 = vadd.f32 %v422_v16, %v1781_v12  ;;  %v478_v0 = vrot.slane %v470_v17, 4  ;;  %v471_v24 = vmul.f32 %v1785_v14, %v1785_v14  ;;  %v428_v26 = vrot.slane %v1785_v14, 4 }
 0x105   :  { %v294_v18 = vpop.f32.mrf.mxu0  ;;  %v490_v25 = vrot.slane %v472_v19, 4  ;;  %v435_v27 = vadd.f32 %v434_v47, %v1783_v13  ;;  %v473_v28 = vmul.f32 %v1787_v15, %v1787_v15  ;;  %v440_v32 = vrot.slane %v1787_v15, 4 }
 0x106   :  { %v335_v20 = vpop.f32.mrf.mxu1  ;;  %v424_v29 = vrot.slane %v423_v23, 2  ;;  %v479_v30 = vadd.f32 %v478_v0, %v470_v17  ;;  %v484_v31 = vrot.slane %v471_v24, 4  ;;  %v429_v34 = vadd.f32 %v428_v26, %v1785_v14 }
 0x107   :  { %v295_v21 = vpop.f32.mrf.mxu0  ;;  %v491_v33 = vadd.f32 %v490_v25, %v472_v19  ;;  %v436_v35 = vrot.slane %v435_v27, 2  ;;  %v496_v36 = vrot.slane %v473_v28, 4  ;;  %v441_v40 = vadd.f32 %v440_v32, %v1787_v15 }
 0x108   :  { %v336_v22 = vpop.f32.mrf.mxu1  ;;  %v425_v37 = vadd.f32 %v424_v29, %v423_v23  ;;  %v480_v38 = vrot.slane %v479_v30, 2  ;;  %v485_v39 = vadd.f32 %v484_v31, %v471_v24  ;;  %v430_v42 = vrot.slane %v429_v34, 2 }
 0x109   :  { %v492_v41 = vrot.slane %v491_v33, 2  ;;  %v437_v43 = vadd.f32 %v436_v35, %v435_v27  ;;  %v497_v44 = vadd.f32 %v496_v36, %v473_v28  ;;  %v442_v49 = vrot.slane %v441_v40, 2 }
 0x10a   :  { %v426_v45 = vrot.slane %v425_v37, 1  ;;  %v481_v46 = vadd.f32 %v480_v38, %v479_v30  ;;  %v486_v48 = vrot.slane %v485_v39, 2  ;;  %v431_v51 = vadd.f32 %v430_v42, %v429_v34 }
 0x10b   :  { %v493_v50 = vadd.f32 %v492_v41, %v491_v33  ;;  %v438_v52 = vrot.slane %v437_v43, 1  ;;  %v498_v53 = vrot.slane %v497_v44, 2  ;;  %v443_v57 = vadd.f32 %v442_v49, %v441_v40 }
 0x10c   :  { %v427_v54 = vadd.f32 %v426_v45, %v425_v37  ;;  %v482_v55 = vrot.slane %v481_v46, 1  ;;  %v487_v56 = vadd.f32 %v486_v48, %v485_v39  ;;  %v432_v59 = vrot.slane %v431_v51, 1 }
 0x10d   :  { %v494_v58 = vrot.slane %v493_v50, 1  ;;  %v439_v60 = vadd.f32 %v438_v52, %v437_v43  ;;  %v499_v61 = vadd.f32 %v498_v53, %v497_v44  ;;  %v444_v2 = vrot.slane %v443_v57, 1 }
 0x10e   :  { %v483_v62 = vadd.f32 %v482_v55, %v481_v46  ;;  %v1805_v63 = vmul.f32 0.125, %v427_v54  ;;  %v488_v1 = vrot.slane %v487_v56, 1  ;;  %v433_v4 = vadd.f32 %v432_v59, %v431_v51 }
 0x10f   :  { %v495_v3 = vadd.f32 %v494_v58, %v493_v50  ;;  %v1807_v5 = vmul.f32 0.125, %v439_v60  ;;  %v500_v6 = vrot.slane %v499_v61, 1  ;;  %v445_v10 = vadd.f32 %v444_v2, %v443_v57 }
 0x110   :  { %v1809_v7 = vmul.f32 0.125, %v483_v62  ;;  %v1813_v8 = vmul.f32 %v1805_v63, %v1805_v63  ;;  %v489_v9 = vadd.f32 %v488_v1, %v487_v56  ;;  %v1819_v17 = vmul.f32 0.125, %v433_v4 }
 0x111   :  { %v1817_v16 = vmul.f32 0.125, %v495_v3  ;;  %v1828_v47 = vmul.f32 %v1807_v5, %v1807_v5  ;;  %v501_v21 = vadd.f32 %v500_v6, %v499_v61  ;;  %v1841_v30 = vmul.f32 0.125, %v445_v10 }
 0x112   :  { %v535_v29 = vmul.f32 0.125, %v489_v9  ;;  %v543_v39 = vmul.f32 %v1819_v17, %v1819_v17  ;;  %v550_v4 = vsub.f32 %v1809_v7, %v1813_v8 }
 0x113   :  { %v537_v44 = vmul.f32 0.125, %v501_v21  ;;  %v545_v50 = vmul.f32 %v1841_v30, %v1841_v30 }
 0x121   :  { %v1815_v11 = vpop.f32.mrf.mxu0 }
 0x122   :  { %v446_v18 = vrot.slane %v1815_v11, 4  ;;  %v474_v19 = vmul.f32 %v1815_v11, %v1815_v11  ;;  %v1824_v20 = vpop.f32.mrf.mxu1 }
 0x123   :  { %v458_v22 = vrot.slane %v1824_v20, 4  ;;  %v476_v23 = vmul.f32 %v1824_v20, %v1824_v20  ;;  %v1833_v0 = vpop.f32.mrf.mxu0 }
 0x124   :  { %v447_v24 = vadd.f32 %v446_v18, %v1815_v11  ;;  %v502_v25 = vrot.slane %v474_v19, 4  ;;  %v452_v26 = vrot.slane %v1833_v0, 4  ;;  %v475_v27 = vmul.f32 %v1833_v0, %v1833_v0  ;;  %v1839_v28 = vpop.f32.mrf.mxu1 }
 0x125   :  { %v459_v31 = vadd.f32 %v458_v22, %v1824_v20  ;;  %v514_v32 = vrot.slane %v476_v23, 4  ;;  %v376_v33 = vpop.f32.mrf.mxu0  ;;  %v464_v37 = vrot.slane %v1839_v28, 4  ;;  %v477_v61 = vmul.f32 %v1839_v28, %v1839_v28 }
 0x126   :  { %v448_v34 = vrot.slane %v447_v24, 2  ;;  %v503_v35 = vadd.f32 %v502_v25, %v474_v19  ;;  %v453_v36 = vadd.f32 %v452_v26, %v1833_v0  ;;  %v417_v38 = vpop.f32.mrf.mxu1  ;;  %v508_v42 = vrot.slane %v475_v27, 4 }
 0x127   :  { %v460_v40 = vrot.slane %v459_v31, 2  ;;  %v515_v41 = vadd.f32 %v514_v32, %v476_v23  ;;  %v377_v43 = vpop.f32.mrf.mxu0  ;;  %v465_v57 = vadd.f32 %v464_v37, %v1839_v28  ;;  %v551_v23 = vsub.f32 %v535_v29, %v543_v39 }
 0x128   :  { %v449_v45 = vadd.f32 %v448_v34, %v447_v24  ;;  %v504_v46 = vrot.slane %v503_v35, 2  ;;  %v454_v48 = vrot.slane %v453_v36, 2  ;;  %v418_v49 = vpop.f32.mrf.mxu1  ;;  %v509_v53 = vadd.f32 %v508_v42, %v475_v27 }
 0x129   :  { %v461_v51 = vadd.f32 %v460_v40, %v459_v31  ;;  %v516_v52 = vrot.slane %v515_v41, 2  ;;  %v466_v3 = vrot.slane %v465_v57, 2  ;;  %v553_v24 = vsub.f32 %v537_v44, %v545_v50 }
 0x12a   :  { %v450_v54 = vrot.slane %v449_v45, 1  ;;  %v505_v55 = vadd.f32 %v504_v46, %v503_v35  ;;  %v455_v56 = vadd.f32 %v454_v48, %v453_v36  ;;  %v510_v60 = vrot.slane %v509_v53, 2 }
 0x12b   :  { %v462_v58 = vrot.slane %v461_v51, 1  ;;  %v517_v59 = vadd.f32 %v516_v52, %v515_v41  ;;  %v467_v22 = vadd.f32 %v466_v3, %v465_v57  ;;  %v520_v26 = vrot.slane %v477_v61, 4 }
 0x12c   :  { %v451_v62 = vadd.f32 %v450_v54, %v449_v45  ;;  %v506_v1 = vrot.slane %v505_v55, 1  ;;  %v456_v2 = vrot.slane %v455_v56, 1  ;;  %v511_v10 = vadd.f32 %v510_v60, %v509_v53 }
 0x12d   :  { %v463_v6 = vadd.f32 %v462_v58, %v461_v51  ;;  %v518_v9 = vrot.slane %v517_v59, 1  ;;  %v468_v33 = vrot.slane %v467_v22, 1  ;;  %v521_v35 = vadd.f32 %v520_v26, %v477_v61 }
 0x12e   :  { %v507_v18 = vadd.f32 %v506_v1, %v505_v55  ;;  %v1855_v19 = vmul.f32 0.125, %v451_v62  ;;  %v457_v21 = vadd.f32 %v456_v2, %v455_v56  ;;  %v512_v25 = vrot.slane %v511_v10, 1 }
 0x12f   :  { %v519_v27 = vadd.f32 %v518_v9, %v517_v59  ;;  %v1857_v31 = vmul.f32 0.125, %v463_v6  ;;  %v552_v36 = vsub.f32 %v1817_v16, %v1828_v47  ;;  %v469_v37 = vadd.f32 %v468_v33, %v467_v22 }
 0x130   :  { %v1859_v32 = vmul.f32 0.125, %v457_v21  ;;  %v538_v34 = vmul.f32 0.125, %v507_v18  ;;  %v546_v7 = vmul.f32 %v1855_v19, %v1855_v19  ;;  %v513_v8 = vadd.f32 %v512_v25, %v511_v10 }
 0x131   :  { %v558_v38 = vadd.f32 1e-05, %v550_v4  ;;  %v522_v40 = vrot.slane %v521_v35, 2  ;;  %v559_v41 = vadd.f32 1e-05, %v551_v23  ;;  %v540_v43 = vmul.f32 0.125, %v519_v27 }
 0x132   :  { %v547_v29 = vmul.f32 %v1859_v32, %v1859_v32  ;;  %v539_v39 = vmul.f32 0.125, %v513_v8  ;;  %v561_v42 = vadd.f32 1e-05, %v553_v24  ;;  %v548_v44 = vmul.f32 %v1857_v31, %v1857_v31 }
 0x133   :  { %v554_v45 = vsub.f32 %v538_v34, %v546_v7  ;;  %v523_v48 = vadd.f32 %v522_v40, %v521_v35  ;;  %v1869_v49 = vmul.f32 0.125, %v469_v37  ;;  %v560_v50 = vadd.f32 1e-05, %v552_v36  ;;  %v420_v37 = vld [vmem:[%s2059_s2] sm:$0xff] }
 0x134   :  { %v555_v46 = vsub.f32 %v539_v39, %v547_v29  ;;  %1617 = vrsqrt.f32 %v558_v38  ;;  %v556_v51 = vsub.f32 %v540_v43, %v548_v44  ;;  %v1710_v59 = vmov 1966171168  }
 0x135   :  { %v524_v47 = vrot.slane %v523_v48, 1  ;;  %1619 = vrsqrt.f32 %v559_v41  ;;  %v562_v52 = vadd.f32 1e-05, %v554_v45  ;;  %v549_v54 = vmul.f32 %v1869_v49, %v1869_v49 }
 0x136   :  { %v563_v16 = vadd.f32 1e-05, %v555_v46  ;;  %1621 = vrsqrt.f32 %v561_v42  ;;  %v564_v56 = vadd.f32 1e-05, %v556_v51  ;;  %v587_v60 = vunpack.c.l.s4 %v1710_v59 }
 0x137   :  { %v525_v53 = vadd.f32 %v524_v47, %v523_v48  ;;  %1623 = vrsqrt.f32 %v560_v50  ;;  %v589_v61 = vlaneseq }
 0x138   :  { %1625 = vrsqrt.f32 %v563_v16  ;;  %v588_v2 = vunpack.c.0.s8 %v587_v60 }
 0x139   :  { %v541_v55 = vmul.f32 0.125, %v525_v53  ;;  %1627 = vrsqrt.f32 %v562_v52  ;;  %v1873_v3 = vshrl.u32 %v589_v61, 7 }
 0x13a   :  { %1629 = vrsqrt.f32 %v564_v56 }
 0x13b   :  { %v557_v57 = vsub.f32 %v541_v55, %v549_v54  ;;  %v1876_v18 = vsub.s32 %v588_v2, %v1873_v3  ;;  %v652_v38 = vsub.s32 4, %v1873_v3  ;;  %v656_v40 = vsub.s32 5, %v1873_v3 }
 0x13c   :  { %v660_v41 = vsub.s32 6, %v1873_v3  ;;  %v664_v42 = vsub.s32 7, %v1873_v3  ;;  %v1892_v43 = vsub.s32 0, %v1873_v3  ;;  %v1895_v44 = vsub.s32 1, %v1873_v3 }
 0x13d   :  { %v565_v58 = vadd.f32 1e-05, %v557_v57  ;;  %v644_v45 = vsub.s32 2, %v1873_v3  ;;  %v648_v46 = vsub.s32 3, %v1873_v3 }
 0x13f   :  { %1631 = vrsqrt.f32 %v565_v58 }
 0x141   :  { %v1618_v62 = vpop.eup %1617 }
 0x142   :  { %v1620_v1 = vpop.eup %1619 }
 0x143   :  { %v1622_v4 = vpop.eup %1621  ;;  %v582_v10 = vcombine.low %v1618_v62, %v1620_v1 }
 0x144   :  { %v1624_v6 = vpop.eup %1623 }
 0x145   :  { %v1626_v9 = vpop.eup %1625  ;;  %v583_v21 = vcombine.low %v1624_v6, %v1622_v4  ;;  %v592_v25 = vrot.slane %v582_v10, %v1876_v18 }
 0x146   :  { %v1628_v22 = vpop.eup %1627 }
 0x147   :  { %v584_v23 = vcombine.low %v1628_v22, %v1626_v9  ;;  %v1630_v24 = vpop.eup %1629  ;;  %v599_v26 = vrot.slane %v583_v21, %v1876_v18  ;;  %v421_v21 = vld [vmem:[%s2060_s3] sm:$0xff] }
 0x149   :  { %v606_v33 = vrot.slane %v584_v23, %v1876_v18  ;;  %v614_v7 = vcombine.low %v592_v25, %v599_v26 }
 0x14b   :  { %v622_v36 = vrot.slane %v614_v7, %v1876_v18 }
 0x14c   :  { %v1632_v27 = vpop.eup %1631 }
 0x14d   :  { %v585_v34 = vcombine.low %v1630_v24, %v1632_v27 }
 0x14f   :  { %v613_v8 = vrot.slane %v585_v34, %v1876_v18 }
 0x151   :  { %v615_v35 = vcombine.low %v606_v33, %v613_v8 }
 0x153   :  { %v629_v29 = vrot.slane %v615_v35, %v1876_v18  ;;  %v970_v35 = vld [vmem:[#allocation5 + $0x4e0] sm:$0xff] }
 0x155   :  { %v630_v39 = vcombine.low %v622_v36, %v629_v29 }
 0x157   :  { %v632_v48 = vmul.f32 %v630_v39, %v420_v37 }
 0x159   :  { %v653_v50 = vrot.slane %v632_v48, %v652_v38  ;;  %v657_v16 = vrot.slane %v632_v48, %v656_v40  ;;  %v661_v47 = vrot.slane %v632_v48, %v660_v41  ;;  %v665_v51 = vrot.slane %v632_v48, %v664_v42 }
 0x15a   :  { %v637_v52 = vrot.slane %v632_v48, %v1892_v43  ;;  %v641_v53 = vrot.slane %v632_v48, %v1895_v44  ;;  %v645_v54 = vrot.slane %v632_v48, %v644_v45  ;;  %v649_v55 = vrot.slane %v632_v48, %v648_v46 }
 0x15b   :  { %v678_v56 = vmul.f32 %v653_v50, %v1855_v19  ;;  %v679_v57 = vmul.f32 %v657_v16, %v1859_v32  ;;  %v680_v58 = vmul.f32 %v661_v47, %v1857_v31  ;;  %v681_v59 = vmul.f32 %v665_v51, %v1869_v49 }
 0x15c   :  { %v674_v60 = vmul.f32 %v637_v52, %v1805_v63  ;;  %v675_v61 = vmul.f32 %v641_v53, %v1819_v17  ;;  %v676_v62 = vmul.f32 %v645_v54, %v1807_v5  ;;  %v677_v3 = vmul.f32 %v649_v55, %v1841_v30 }
 0x15d   :  { %v692_v1 = vcombine.low %v678_v56, %v679_v57  ;;  %v693_v2 = vcombine.low %v680_v58, %v681_v59  ;;  %v745_v49 = vmul.f32 %v653_v50, %v1815_v11  ;;  %v747_v63 = vmul.f32 %v661_v47, %v1824_v20  ;;  %v1034_v50 = vld [vmem:[#allocation5 + $0x6e0] sm:$0xff]  ;;  %v1031_v56 = vld [vmem:[#allocation5 + $0x6c8] sm:$0xff]  ;;  %v1033_v57 = vld [vmem:[#allocation5 + $0x6d8] sm:$0xff] }
 0x15e   :  { %v690_v4 = vcombine.low %v674_v60, %v675_v61  ;;  %v691_v32 = vcombine.low %v676_v62, %v677_v3  ;;  %v748_v23 = vmul.f32 %v665_v51, %v1839_v28  ;;  %v742_v11 = vmul.f32 %v641_v53, %v1785_v14  ;;  %v966_v62 = vld [vmem:[#allocation5 + $0x4c0] sm:$0xff]  ;;  %v1032_v3 = vld [vmem:[#allocation5 + $0x6d0] sm:$0xff] }
 0x15f   :  { %v714_v6 = vrot.slane %v692_v1, %v1876_v18  ;;  %v721_v19 = vrot.slane %v693_v2, %v1876_v18  ;;  %v744_v20 = vmul.f32 %v649_v55, %v1787_v15  ;;  %v741_v25 = vmul.f32 %v637_v52, %v1781_v12  ;;  %v972_v12 = vld [vmem:[#allocation5 + $0x4f0] sm:$0xff]  ;;  %v969_v55 = vld [vmem:[#allocation5 + $0x4d8] sm:$0xff]  ;;  %v1030_v2 = vld [vmem:[#allocation5 + $0x6c0] sm:$0xff] }
 0x160   :  { %v700_v31 = vrot.slane %v690_v4, %v1876_v18  ;;  %v707_v17 = vrot.slane %v691_v32, %v1876_v18  ;;  %v743_v26 = vmul.f32 %v645_v54, %v1783_v13  ;;  %v746_v27 = vmul.f32 %v657_v16, %v1833_v0  ;;  %v1036_v13 = vld [vmem:[#allocation5 + $0x6f0] sm:$0xff]  ;;  %v963_v4 = vld [vmem:[#allocation5 + $0x4a8] sm:$0xff]  ;;  %v965_v32 = vld [vmem:[#allocation5 + $0x4b8] sm:$0xff] }
 0x161   :  { %v723_v9 = vcombine.low %v714_v6, %v721_v19  ;;  %v968_v1 = vld [vmem:[#allocation5 + $0x4d0] sm:$0xff]  ;;  %v1179_v19 = vpack.c.bf16 %v1033_v57, %v1031_v56  ;;  %v1014_v57 = vld [vmem:[#allocation5 + $0x640] sm:$0xff] }
 0x162   :  { %v722_v10 = vcombine.low %v700_v31, %v707_v17  ;;  %v1027_v31 = vld [vmem:[#allocation5 + $0x6a8] sm:$0xff]  ;;  %v1146_v17 = vpack.c.bf16 %v968_v1, %v966_v62  ;;  %v1013_v62 = vld [vmem:[#allocation5 + $0x638] sm:$0xff] }
 0x163   :  { %v737_v5 = vrot.slane %v723_v9, %v1876_v18 }
 0x164   :  { %v730_v30 = vrot.slane %v722_v10, %v1876_v18  ;;  %v962_v10 = vld [vmem:[#allocation5 + $0x4a0] sm:$0xff] }
 0x166   :  { %v738_v22 = vcombine.low %v730_v30, %v737_v5  ;;  %v1178_v5 = vpack.c.bf16 %v1032_v3, %v1030_v2  ;;  %v964_v30 = vld [vmem:[#allocation5 + $0x4b0] sm:$0xff]  ;;  %v946_v3 = vld [vmem:[#allocation5 + $0x420] sm:$0xff] }
 0x168   :  { %v740_v24 = vsub.f32 %v421_v21, %v738_v22  ;;  %v1145_v21 = vpack.c.bf16 %v965_v32, %v963_v4  ;;  %v948_v4 = vld [vmem:[#allocation5 + $0x430] sm:$0xff]  ;;  %v1010_v32 = vld [vmem:[#allocation5 + $0x620] sm:$0xff] }
 0x16a   :  { %v757_v33 = vrot.slane %v740_v24, %v1895_v44  ;;  %v765_v34 = vrot.slane %v740_v24, %v648_v46  ;;  %v753_v7 = vrot.slane %v740_v24, %v1892_v43  ;;  %v761_v8 = vrot.slane %v740_v24, %v644_v45 }
 0x16b   :  { %v773_v36 = vrot.slane %v740_v24, %v656_v40  ;;  %v781_v28 = vrot.slane %v740_v24, %v664_v42  ;;  %v769_v29 = vrot.slane %v740_v24, %v652_v38  ;;  %v777_v37 = vrot.slane %v740_v24, %v660_v41  ;;  %v967_v42 = vld [vmem:[#allocation5 + $0x4c8] sm:$0xff]  ;;  %v1028_v24 = vld [vmem:[#allocation5 + $0x6b0] sm:$0xff] }
 0x16c   :  { %v791_v14 = vadd.f32 %v757_v33, %v742_v11  ;;  %v793_v39 = vadd.f32 %v765_v34, %v744_v20  ;;  %v790_v15 = vadd.f32 %v753_v7, %v741_v25  ;;  %v792_v48 = vadd.f32 %v761_v8, %v743_v26  ;;  %v959_v11 = vld [vmem:[#allocation5 + $0x488] sm:$0xff]  ;;  %v961_v20 = vld [vmem:[#allocation5 + $0x498] sm:$0xff]  ;;  %v958_v34 = vld [vmem:[#allocation5 + $0x480] sm:$0xff] }
 0x16d   :  { %v795_v47 = vadd.f32 %v773_v36, %v746_v27  ;;  %v797_v0 = vadd.f32 %v781_v28, %v748_v23  ;;  %v1928_v16 = vadd.f32 %v769_v29, %v745_v49  ;;  %v1930_v46 = vadd.f32 %v777_v37, %v747_v63  ;;  %v1029_v49 = vld [vmem:[#allocation5 + $0x6b8] sm:$0xff]  ;;  %v1026_v23 = vld [vmem:[#allocation5 + $0x6a0] sm:$0xff]  ;;  %v1023_v25 = vld [vmem:[#allocation5 + $0x688] sm:$0xff] }
 0x16e   :  { %v799_v51 = vmax.f32 %v791_v14, 0.0  ;;  %v801_v45 = vmax.f32 %v793_v39, 0.0  ;;  %v798_v52 = vmax.f32 %v790_v15, 0.0  ;;  %v800_v40 = vmax.f32 %v792_v48, 0.0  ;;  %v1025_v26 = vld [vmem:[#allocation5 + $0x698] sm:$0xff]  ;;  %v960_v7 = vld [vmem:[#allocation5 + $0x490] sm:$0xff] }
 0x16f   :  { %v1148_v38 = vpack.c.bf16 %v972_v12, %v970_v35  ;;  %v1180_v41 = vpack.c.bf16 %v1036_v13, %v1034_v50  ;;  %v803_v53 = vmax.f32 %v795_v47, 0.0  ;;  %v805_v54 = vmax.f32 %v797_v0, 0.0  ;;  %v1022_v36 = vld [vmem:[#allocation5 + $0x680] sm:$0xff]  ;;  %v1024_v28 = vld [vmem:[#allocation5 + $0x690] sm:$0xff]  ;;  %v955_v29 = vld [vmem:[#allocation5 + $0x468] sm:$0xff] }
 0x170   :  { %v807_v58 = vpack.c.bf16 %v799_v51, %v799_v51  ;;  %v809_v59 = vpack.c.bf16 %v801_v45, %v801_v45  ;;  %v806_v60 = vpack.c.bf16 %v798_v52, %v798_v52  ;;  %v808_v61 = vpack.c.bf16 %v800_v40, %v800_v40  ;;  %v957_v37 = vld [vmem:[#allocation5 + $0x478] sm:$0xff]  ;;  %v1019_v14 = vld [vmem:[#allocation5 + $0x668] sm:$0xff]  ;;  %v954_v12 = vld [vmem:[#allocation5 + $0x460] sm:$0xff] }
 0x171   :  { %v1147_v6 = vpack.c.bf16 %v969_v55, %v967_v42  ;;  %v811_v63 = vpack.c.bf16 %v803_v53, %v803_v53  ;;  %v813_v9 = vpack.c.bf16 %v805_v54, %v805_v54  ;;  %v1177_v22 = vpack.c.bf16 %v1029_v49, %v1027_v31  ;;  %v1021_v39 = vld [vmem:[#allocation5 + $0x678] sm:$0xff]  ;;  %v956_v50 = vld [vmem:[#allocation5 + $0x470] sm:$0xff]  ;;  %v1018_v0 = vld [vmem:[#allocation5 + $0x660] sm:$0xff] }
 0x172   :  { %1230 = vmatprep.mubr.bf16.mxu0 %v807_v58  ;;  %1271 = vmatprep.mubr.bf16.mxu1 %v809_v59  ;;  %v1144_v27 = vpack.c.bf16 %v964_v30, %v962_v10  ;;  %v1176_v33 = vpack.c.bf16 %v1028_v24, %v1026_v23  ;;  %v1143_v8 = vpack.c.bf16 %v961_v20, %v959_v11  ;;  %v1020_v51 = vld [vmem:[#allocation5 + $0x670] sm:$0xff]  ;;  %v951_v45 = vld [vmem:[#allocation5 + $0x448] sm:$0xff]  ;;  %v953_v52 = vld [vmem:[#allocation5 + $0x458] sm:$0xff] }
 0x173   :  { %1231 = vmatmul.mubr.bf16.vlgmr.msra.gmra.mxu0 %v806_v60  ;;  %1272 = vmatmul.mubr.bf16.vlgmr.msra.gmra.mxu1 %v808_v61  ;;  %v1175_v35 = vpack.c.bf16 %v1025_v26, %v1023_v25  ;;  %v1142_v15 = vpack.c.bf16 %v960_v7, %v958_v34  ;;  %v1174_v48 = vpack.c.bf16 %v1024_v28, %v1022_v36  ;;  %v1015_v40 = vld [vmem:[#allocation5 + $0x648] sm:$0xff]  ;;  %v1017_v42 = vld [vmem:[#allocation5 + $0x658] sm:$0xff]  ;;  %v950_v53 = vld [vmem:[#allocation5 + $0x440] sm:$0xff] }
 0x174   :  { %1281 = vmatpush1.bf16.msra.mxu0 %v1148_v38  ;;  %1322 = vmatpush1.bf16.msra.mxu1 %v1180_v41  ;;  %v1141_v13 = vpack.c.bf16 %v957_v37, %v955_v29  ;;  %v1173_v47 = vpack.c.bf16 %v1021_v39, %v1019_v14  ;;  %v1140_v38 = vpack.c.bf16 %v956_v50, %v954_v12  ;;  %v952_v54 = vld [vmem:[#allocation5 + $0x450] sm:$0xff]  ;;  %v947_v59 = vld [vmem:[#allocation5 + $0x428] sm:$0xff]  ;;  %v949_v60 = vld [vmem:[#allocation5 + $0x438] sm:$0xff] }
 0x175   :  { %1312 = vmatprep.mubr.bf16.mxu0 %v811_v63  ;;  %1353 = vmatprep.mubr.bf16.mxu1 %v813_v9  ;;  %v1172_v41 = vpack.c.bf16 %v1020_v51, %v1018_v0  ;;  %v1139_v55 = vpack.c.bf16 %v953_v52, %v951_v45  ;;  %v1171_v56 = vpack.c.bf16 %v1017_v42, %v1015_v40  ;;  %v1016_v58 = vld [vmem:[#allocation5 + $0x650] sm:$0xff]  ;;  %v1011_v61 = vld [vmem:[#allocation5 + $0x628] sm:$0xff]  ;;  %v945_v63 = vld [vmem:[#allocation5 + $0x418] sm:$0xff] }
 0x176   :  { %1282 = vmatprep.subr.bf16.mxu0 %v1147_v6  ;;  %1323 = vmatprep.subr.bf16.mxu1 %v1179_v19  ;;  %v1138_v1 = vpack.c.bf16 %v952_v54, %v950_v53  ;;  %v1170_v2 = vpack.c.bf16 %v1016_v58, %v1014_v57  ;;  %v1137_v6 = vpack.c.bf16 %v949_v60, %v947_v59  ;;  %v1012_v31 = vld [vmem:[#allocation5 + $0x630] sm:$0xff]  ;;  %v943_v49 = vld [vmem:[#allocation5 + $0x408] sm:$0xff]  ;;  %v942_v30 = vld [vmem:[#allocation5 + $0x400] sm:$0xff] }
 0x177   :  { %v1169_v19 = vpack.c.bf16 %v1013_v62, %v1011_v61  ;;  %v1007_v9 = vld [vmem:[#allocation5 + $0x608] sm:$0xff]  ;;  %v1168_v10 = vpack.c.bf16 %v1012_v31, %v1010_v32  ;;  %v1006_v24 = vld [vmem:[#allocation5 + $0x600] sm:$0xff]  ;;  %v1008_v11 = vld [vmem:[#allocation5 + $0x610] sm:$0xff] }
 0x178   :  { %1283 = vmatpush1.bf16.msra.mxu0 %v1146_v17  ;;  %1324 = vmatpush1.bf16.msra.mxu1 %v1178_v5  ;;  %v1009_v17 = vld [vmem:[#allocation5 + $0x618] sm:$0xff]  ;;  %v1136_v5 = vpack.c.bf16 %v948_v4, %v946_v3  ;;  %v1003_v20 = vld [vmem:[#allocation5 + $0x5e8] sm:$0xff]  ;;  %v1166_v34 = vpack.c.bf16 %v1008_v11, %v1006_v24  ;;  %v1002_v7 = vld [vmem:[#allocation5 + $0x5e0] sm:$0xff] }
 0x179   :  { %1284 = vmatprep.subr.bf16.mxu0 %v1145_v21  ;;  %1325 = vmatprep.subr.bf16.mxu1 %v1177_v22  ;;  %v944_v21 = vld [vmem:[#allocation5 + $0x410] sm:$0xff]  ;;  %v1135_v22 = vpack.c.bf16 %v945_v63, %v943_v49  ;;  %v1167_v23 = vpack.c.bf16 %v1009_v17, %v1007_v9  ;;  %v1005_v25 = vld [vmem:[#allocation5 + $0x5f8] sm:$0xff]  ;;  %v1067_v26 = vld [vmem:[#allocation5 + $0x7e8] sm:$0xff] }
 0x17a   :  { %v1066_v28 = vld [vmem:[#allocation5 + $0x7e0] sm:$0xff]  ;;  %v1068_v29 = vld [vmem:[#allocation5 + $0x7f0] sm:$0xff]  ;;  %v999_v37 = vld [vmem:[#allocation5 + $0x5c8] sm:$0xff] }
 0x17b   :  { %v1001_v14 = vld [vmem:[#allocation5 + $0x5d8] sm:$0xff]  ;;  %v1063_v39 = vld [vmem:[#allocation5 + $0x7c8] sm:$0xff]  ;;  %v1196_v12 = vpack.c.bf16 %v1068_v29, %v1066_v28  ;;  %v998_v50 = vld [vmem:[#allocation5 + $0x5c0] sm:$0xff] }
 0x17c   :  { %1285 = vmatpush1.bf16.msra.mxu0 %v1144_v27  ;;  %1326 = vmatpush1.bf16.msra.mxu1 %v1176_v33  ;;  %v1069_v27 = vld [vmem:[#allocation5 + $0x7f8] sm:$0xff]  ;;  %v1134_v33 = vpack.c.bf16 %v944_v21, %v942_v30  ;;  %v1062_v51 = vld [vmem:[#allocation5 + $0x7c0] sm:$0xff]  ;;  %v1064_v45 = vld [vmem:[#allocation5 + $0x7d0] sm:$0xff] }
 0x17d   :  { %1286 = vmatprep.subr.bf16.mxu0 %v1143_v8  ;;  %1327 = vmatprep.subr.bf16.mxu1 %v1175_v35  ;;  %v1004_v8 = vld [vmem:[#allocation5 + $0x5f0] sm:$0xff]  ;;  %v1165_v35 = vpack.c.bf16 %v1005_v25, %v1003_v20  ;;  %v1197_v36 = vpack.c.bf16 %v1069_v27, %v1067_v26  ;;  %v995_v52 = vld [vmem:[#allocation5 + $0x5a8] sm:$0xff]  ;;  %v997_v40 = vld [vmem:[#allocation5 + $0x5b8] sm:$0xff]  ;;  %v1194_v53 = vpack.c.bf16 %v1064_v45, %v1062_v51 }
 0x17e   :  { %v1059_v42 = vld [vmem:[#allocation5 + $0x7a8] sm:$0xff]  ;;  %v994_v54 = vld [vmem:[#allocation5 + $0x5a0] sm:$0xff]  ;;  %v1060_v59 = vld [vmem:[#allocation5 + $0x7b0] sm:$0xff] }
 0x17f   :  { %v1058_v58 = vld [vmem:[#allocation5 + $0x7a0] sm:$0xff]  ;;  %v991_v60 = vld [vmem:[#allocation5 + $0x588] sm:$0xff]  ;;  %v993_v61 = vld [vmem:[#allocation5 + $0x598] sm:$0xff] }
 0x180   :  { %1287 = vmatpush1.bf16.msra.mxu0 %v1142_v15  ;;  %1328 = vmatpush1.bf16.msra.mxu1 %v1174_v48  ;;  %v1065_v15 = vld [vmem:[#allocation5 + $0x7d8] sm:$0xff]  ;;  %v1164_v48 = vpack.c.bf16 %v1004_v8, %v1002_v7  ;;  %v1055_v62 = vld [vmem:[#allocation5 + $0x788] sm:$0xff]  ;;  %v1192_v3 = vpack.c.bf16 %v1060_v59, %v1058_v58  ;;  %v990_v4 = vld [vmem:[#allocation5 + $0x580] sm:$0xff] }
 0x181   :  { %1288 = vmatprep.subr.bf16.mxu0 %v1141_v13  ;;  %1329 = vmatprep.subr.bf16.mxu1 %v1173_v47  ;;  %v1000_v13 = vld [vmem:[#allocation5 + $0x5d0] sm:$0xff]  ;;  %v1163_v47 = vpack.c.bf16 %v1001_v14, %v999_v37  ;;  %v1195_v0 = vpack.c.bf16 %v1065_v15, %v1063_v39  ;;  %v1054_v31 = vld [vmem:[#allocation5 + $0x780] sm:$0xff]  ;;  %v987_v63 = vld [vmem:[#allocation5 + $0x568] sm:$0xff] }
 0x182   :  { %v1056_v49 = vld [vmem:[#allocation5 + $0x790] sm:$0xff]  ;;  %v989_v9 = vld [vmem:[#allocation5 + $0x578] sm:$0xff]  ;;  %v1051_v17 = vld [vmem:[#allocation5 + $0x768] sm:$0xff] }
 0x183   :  { %v1190_v30 = vpack.c.bf16 %v1056_v49, %v1054_v31  ;;  %v986_v21 = vld [vmem:[#allocation5 + $0x560] sm:$0xff]  ;;  %v1052_v20 = vld [vmem:[#allocation5 + $0x770] sm:$0xff]  ;;  %v983_v25 = vld [vmem:[#allocation5 + $0x548] sm:$0xff] }
 0x184   :  { %1289 = vmatpush1.bf16.msra.mxu0 %v1140_v38  ;;  %1330 = vmatpush1.bf16.msra.mxu1 %v1172_v41  ;;  %v1061_v38 = vld [vmem:[#allocation5 + $0x7b8] sm:$0xff]  ;;  %v1162_v41 = vpack.c.bf16 %v1000_v13, %v998_v50  ;;  %v1050_v11 = vld [vmem:[#allocation5 + $0x760] sm:$0xff]  ;;  %v1047_v27 = vld [vmem:[#allocation5 + $0x748] sm:$0xff] }
 0x185   :  { %1290 = vmatprep.subr.bf16.mxu0 %v1139_v55  ;;  %1331 = vmatprep.subr.bf16.mxu1 %v1171_v56  ;;  %v996_v55 = vld [vmem:[#allocation5 + $0x5b0] sm:$0xff]  ;;  %v1161_v56 = vpack.c.bf16 %v997_v40, %v995_v52  ;;  %v1193_v57 = vpack.c.bf16 %v1061_v38, %v1059_v42  ;;  %v985_v26 = vld [vmem:[#allocation5 + $0x558] sm:$0xff]  ;;  %v1188_v7 = vpack.c.bf16 %v1052_v20, %v1050_v11  ;;  %v982_v8 = vld [vmem:[#allocation5 + $0x540] sm:$0xff] }
 0x186   :  { %v1046_v29 = vld [vmem:[#allocation5 + $0x740] sm:$0xff]  ;;  %v1048_v37 = vld [vmem:[#allocation5 + $0x750] sm:$0xff]  ;;  %v979_v14 = vld [vmem:[#allocation5 + $0x528] sm:$0xff] }
 0x187   :  { %v981_v39 = vld [vmem:[#allocation5 + $0x538] sm:$0xff]  ;;  %v1043_v15 = vld [vmem:[#allocation5 + $0x728] sm:$0xff]  ;;  %v1186_v50 = vpack.c.bf16 %v1048_v37, %v1046_v29  ;;  %v978_v13 = vld [vmem:[#allocation5 + $0x520] sm:$0xff] }
 0x188   :  { %1291 = vmatpush1.bf16.msra.mxu0 %v1138_v1  ;;  %1332 = vmatpush1.bf16.msra.mxu1 %v1170_v2  ;;  %v1057_v1 = vld [vmem:[#allocation5 + $0x798] sm:$0xff]  ;;  %v1160_v2 = vpack.c.bf16 %v996_v55, %v994_v54  ;;  %v1042_v45 = vld [vmem:[#allocation5 + $0x720] sm:$0xff]  ;;  %v1044_v52 = vld [vmem:[#allocation5 + $0x730] sm:$0xff] }
 0x189   :  { %1292 = vmatprep.subr.bf16.mxu0 %v1137_v6  ;;  %1333 = vmatprep.subr.bf16.mxu1 %v1169_v19  ;;  %v992_v6 = vld [vmem:[#allocation5 + $0x590] sm:$0xff]  ;;  %v1159_v19 = vpack.c.bf16 %v993_v61, %v991_v60  ;;  %v1191_v32 = vpack.c.bf16 %v1057_v1, %v1055_v62  ;;  %v975_v40 = vld [vmem:[#allocation5 + $0x508] sm:$0xff]  ;;  %v977_v42 = vld [vmem:[#allocation5 + $0x518] sm:$0xff]  ;;  %v1184_v54 = vpack.c.bf16 %v1044_v52, %v1042_v45  ;;  %v802_v1 = vmax.f32 %v1928_v16, 0.0 }
 0x18a   :  { %v1039_v38 = vld [vmem:[#allocation5 + $0x708] sm:$0xff]  ;;  %v974_v55 = vld [vmem:[#allocation5 + $0x500] sm:$0xff]  ;;  %v976_v58 = vld [vmem:[#allocation5 + $0x510] sm:$0xff] }
 0x18b   :  { %v1038_v59 = vld [vmem:[#allocation5 + $0x700] sm:$0xff]  ;;  %v1040_v60 = vld [vmem:[#allocation5 + $0x710] sm:$0xff]  ;;  %v1150_v61 = vpack.c.bf16 %v976_v58, %v974_v55  ;;  %v1501_v49 = vld [vmem:[%s2064_s7 + $0xe8] sm:$0xff] }
 0x18c   :  { %1293 = vmatpush1.bf16.msra.mxu0 %v1136_v5  ;;  %1334 = vmatpush1.bf16.msra.mxu1 %v1168_v10  ;;  %v1053_v5 = vld [vmem:[#allocation5 + $0x778] sm:$0xff]  ;;  %v1158_v10 = vpack.c.bf16 %v992_v6, %v990_v4  ;;  %v1182_v62 = vpack.c.bf16 %v1040_v60, %v1038_v59  ;;  %v1502_v6 = vld [vmem:[%s2064_s7 + $0xf0] sm:$0xff]  ;;  %v1500_v31 = vld [vmem:[%s2064_s7 + $0xe0] sm:$0xff] }
 0x18d   :  { %1294 = vmatprep.subr.bf16.mxu0 %v1135_v22  ;;  %1335 = vmatprep.subr.bf16.mxu1 %v1167_v23  ;;  %v988_v22 = vld [vmem:[#allocation5 + $0x570] sm:$0xff]  ;;  %v1157_v23 = vpack.c.bf16 %v989_v9, %v987_v63  ;;  %v1189_v24 = vpack.c.bf16 %v1053_v5, %v1051_v17  ;;  %v1518_v9 = vpack.c.bf16 %v1501_v49, %v1500_v31  ;;  %v1484_v17 = vld [vmem:[%s2064_s7 + $0x60] sm:$0xff]  ;;  %v1485_v5 = vld [vmem:[%s2064_s7 + $0x68] sm:$0xff] }
 0x18e   :  { %v1486_v16 = vld [vmem:[%s2064_s7 + $0x70] sm:$0xff]  ;;  %v1496_v11 = vld [vmem:[%s2064_s7 + $0xc0] sm:$0xff]  ;;  %v1497_v20 = vld [vmem:[%s2064_s7 + $0xc8] sm:$0xff] }
 0x18f   :  { %v1492_v29 = vld [vmem:[%s2064_s7 + $0xa0] sm:$0xff]  ;;  %v1493_v37 = vld [vmem:[%s2064_s7 + $0xa8] sm:$0xff] }
 0x190   :  { %1295 = vmatpush1.bf16.msra.mxu0 %v1134_v33  ;;  %1336 = vmatpush1.bf16.msra.mxu1 %v1166_v34  ;;  %v1049_v33 = vld [vmem:[#allocation5 + $0x758] sm:$0xff]  ;;  %v1156_v34 = vpack.c.bf16 %v988_v22, %v986_v21  ;;  %v1510_v21 = vpack.c.bf16 %v1485_v5, %v1484_v17  ;;  %v1488_v45 = vld [vmem:[%s2064_s7 + $0x80] sm:$0xff]  ;;  %v1489_v52 = vld [vmem:[%s2064_s7 + $0x88] sm:$0xff] }
 0x191   :  { %1296 = vmatprep.subr.bf16.mxu0 %v1165_v35  ;;  %1337 = vmatprep.subr.bf16.mxu1 %v1197_v36  ;;  %v984_v35 = vld [vmem:[#allocation5 + $0x550] sm:$0xff]  ;;  %v1155_v36 = vpack.c.bf16 %v985_v26, %v983_v25  ;;  %v1187_v28 = vpack.c.bf16 %v1049_v33, %v1047_v27  ;;  %v1516_v26 = vpack.c.bf16 %v1497_v20, %v1496_v11  ;;  %v1480_v27 = vld [vmem:[%s2064_s7 + $0x40] sm:$0xff]  ;;  %v1481_v33 = vld [vmem:[%s2064_s7 + $0x48] sm:$0xff] }
 0x194   :  { %1297 = vmatpush2.bf16.msra.mxu0 %v1164_v48  ;;  %1338 = vmatpush2.bf16.msra.mxu1 %v1196_v12  ;;  %v1045_v48 = vld [vmem:[#allocation5 + $0x738] sm:$0xff]  ;;  %v1154_v12 = vpack.c.bf16 %v984_v35, %v982_v8  ;;  %v1508_v8 = vpack.c.bf16 %v1481_v33, %v1480_v27 }
 0x195   :  { %1298 = vmatprep.subr.bf16.mxu0 %v1163_v47  ;;  %1339 = vmatprep.subr.bf16.mxu1 %v1195_v0  ;;  %v980_v47 = vld [vmem:[#allocation5 + $0x530] sm:$0xff]  ;;  %v1153_v0 = vpack.c.bf16 %v981_v39, %v979_v14  ;;  %v1185_v51 = vpack.c.bf16 %v1045_v48, %v1043_v15  ;;  %v1514_v39 = vpack.c.bf16 %v1493_v37, %v1492_v29  ;;  %v1476_v15 = vld [vmem:[%s2064_s7 + $0x20] sm:$0xff]  ;;  %v1477_v48 = vld [vmem:[%s2064_s7 + $0x28] sm:$0xff] }
 0x198   :  { %1299 = vmatpush2.bf16.msra.mxu0 %v1162_v41  ;;  %1340 = vmatpush2.bf16.msra.mxu1 %v1194_v53  ;;  %v1041_v41 = vld [vmem:[#allocation5 + $0x718] sm:$0xff]  ;;  %v1152_v53 = vpack.c.bf16 %v980_v47, %v978_v13  ;;  %v1506_v13 = vpack.c.bf16 %v1477_v48, %v1476_v15 }
 0x199   :  { %1300 = vmatprep.subr.bf16.mxu0 %v1161_v56  ;;  %1341 = vmatprep.subr.bf16.mxu1 %v1193_v57  ;;  %v1151_v56 = vpack.c.bf16 %v977_v42, %v975_v40  ;;  %v1183_v57 = vpack.c.bf16 %v1041_v41, %v1039_v38  ;;  %v1512_v42 = vpack.c.bf16 %v1489_v52, %v1488_v45  ;;  %v1472_v38 = vld [vmem:[%s2064_s7] sm:$0xff]  ;;  %v1473_v41 = vld [vmem:[%s2064_s7 + $0x8] sm:$0xff] }
 0x19c   :  { %1301 = vmatpush2.bf16.msra.mxu0 %v1160_v2  ;;  %1342 = vmatpush2.bf16.msra.mxu1 %v1192_v3  ;;  %v804_v2 = vmax.f32 %v1930_v46, 0.0  ;;  %v810_v3 = vpack.c.bf16 %v802_v1, %v802_v1  ;;  %v1487_v46 = vld [vmem:[%s2064_s7 + $0x78] sm:$0xff] }
 0x19d   :  { %1302 = vmatprep.subr.bf16.mxu0 %v1159_v19  ;;  %1343 = vmatprep.subr.bf16.mxu1 %v1191_v32  ;;  %v1503_v19 = vld [vmem:[%s2064_s7 + $0xf8] sm:$0xff]  ;;  %v1511_v63 = vpack.c.bf16 %v1487_v46, %v1486_v16 }
 0x19e   :  { %v812_v4 = vpack.c.bf16 %v804_v2, %v804_v2  ;;  %v1519_v32 = vpack.c.bf16 %v1503_v19, %v1502_v6 }
 0x1a0   :  { %1303 = vmatpush2.bf16.msra.mxu0 %v1158_v10  ;;  %1344 = vmatpush2.bf16.msra.mxu1 %v1190_v30  ;;  %v1498_v10 = vld [vmem:[%s2064_s7 + $0xd0] sm:$0xff]  ;;  %v1499_v30 = vld [vmem:[%s2064_s7 + $0xd8] sm:$0xff] }
 0x1a1   :  { %1304 = vmatprep.subr.bf16.mxu0 %v1157_v23  ;;  %1345 = vmatprep.subr.bf16.mxu1 %v1189_v24  ;;  %v1517_v22 = vpack.c.bf16 %v1499_v30, %v1498_v10  ;;  %v1482_v23 = vld [vmem:[%s2064_s7 + $0x50] sm:$0xff]  ;;  %v1483_v24 = vld [vmem:[%s2064_s7 + $0x58] sm:$0xff] }
 0x1a2   :  { %v1509_v25 = vpack.c.bf16 %v1483_v24, %v1482_v23 }
 0x1a4   :  { %1305 = vmatpush2.bf16.msra.mxu0 %v1156_v34  ;;  %1346 = vmatpush2.bf16.msra.mxu1 %v1188_v7  ;;  %v1494_v34 = vld [vmem:[%s2064_s7 + $0xb0] sm:$0xff]  ;;  %v1495_v7 = vld [vmem:[%s2064_s7 + $0xb8] sm:$0xff] }
 0x1a5   :  { %1306 = vmatprep.subr.bf16.mxu0 %v1155_v36  ;;  %1347 = vmatprep.subr.bf16.mxu1 %v1187_v28  ;;  %v1515_v35 = vpack.c.bf16 %v1495_v7, %v1494_v34  ;;  %v1478_v36 = vld [vmem:[%s2064_s7 + $0x30] sm:$0xff]  ;;  %v1479_v28 = vld [vmem:[%s2064_s7 + $0x38] sm:$0xff] }
 0x1a6   :  { %v1507_v14 = vpack.c.bf16 %v1479_v28, %v1478_v36 }
 0x1a8   :  { %1307 = vmatpush2.bf16.msra.mxu0 %v1154_v12  ;;  %1348 = vmatpush2.bf16.msra.mxu1 %v1186_v50  ;;  %v1490_v12 = vld [vmem:[%s2064_s7 + $0x90] sm:$0xff]  ;;  %v1491_v50 = vld [vmem:[%s2064_s7 + $0x98] sm:$0xff] }
 0x1a9   :  { %1308 = vmatprep.subr.bf16.mxu0 %v1153_v0  ;;  %1349 = vmatprep.subr.bf16.mxu1 %v1185_v51  ;;  %v1513_v47 = vpack.c.bf16 %v1491_v50, %v1490_v12  ;;  %v1474_v0 = vld [vmem:[%s2064_s7 + $0x10] sm:$0xff]  ;;  %v1475_v51 = vld [vmem:[%s2064_s7 + $0x18] sm:$0xff] }
 0x1aa   :  { %v1505_v40 = vpack.c.bf16 %v1475_v51, %v1474_v0 }
 0x1ac   :  { %1309 = vmatpush2.bf16.msra.mxu0 %v1152_v53  ;;  %1350 = vmatpush2.bf16.msra.mxu1 %v1184_v54  ;;  %v1504_v53 = vpack.c.bf16 %v1473_v41, %v1472_v38 }
 0x1ad   :  { %1310 = vmatprep.subr.bf16.mxu0 %v1151_v56  ;;  %1351 = vmatprep.subr.bf16.mxu1 %v1183_v57 }
 0x1b0   :  { %1311 = vmatpush2.bf16.msra.mxu0 %v1150_v61  ;;  %1352 = vmatpush2.bf16.msra.mxu1 %v1182_v62 }
 0x1b1   :  { %1586 = vmatprep.subr.bf16.mxu0 %v1519_v32 }
 0x1b3   :  { %1313 = vmatmul.mubr.bf16.vlgmr.msra.gmra.mxu0 %v810_v3  ;;  %1354 = vmatmul.mubr.bf16.vlgmr.msra.gmra.mxu1 %v812_v4 }
 0x1b4   :  { %1587 = vmatpush3.bf16.msra.mxu0 %v1511_v63 }
 0x1b5   :  { %1588 = vmatprep.subr.bf16.mxu0 %v1518_v9 }
 0x1b8   :  { %1589 = vmatpush3.bf16.msra.mxu0 %v1510_v21 }
 0x1b9   :  { %1590 = vmatprep.subr.bf16.mxu0 %v1517_v22 }
 0x1bc   :  { %1591 = vmatpush3.bf16.msra.mxu0 %v1509_v25 }
 0x1bd   :  { %1592 = vmatprep.subr.bf16.mxu0 %v1516_v26 }
 0x1c0   :  { %1593 = vmatpush3.bf16.msra.mxu0 %v1508_v8 }
 0x1c1   :  { %1594 = vmatprep.subr.bf16.mxu0 %v1515_v35 }
 0x1c4   :  { %1595 = vmatpush3.bf16.msra.mxu0 %v1507_v14 }
 0x1c5   :  { %1596 = vmatprep.subr.bf16.mxu0 %v1514_v39 }
 0x1c8   :  { %1597 = vmatpush3.bf16.msra.mxu0 %v1506_v13 }
 0x1c9   :  { %1598 = vmatprep.subr.bf16.mxu0 %v1513_v47 }
 0x1cc   :  { %1599 = vmatpush3.bf16.msra.mxu0 %v1505_v40 }
 0x1cd   :  { %1600 = vmatprep.subr.bf16.mxu0 %v1512_v42 }
 0x1d0   :  { %1601 = vmatpush3.bf16.msra.mxu0 %v1504_v53 }
 0x233   :  { %v1232_v54 = vpop.f32.mrf.mxu0  ;;  %v1273_v55 = vpop.f32.mrf.mxu1 }
 0x234   :  { %v1274_v56 = vadd.f32 %v1273_v55, %v1232_v54  ;;  %v1362_v55 = vld [vmem:[%s2062_s5] sm:$0x3] }
 0x235   :  { %v1234_v57 = vpop.f32.mrf.mxu0  ;;  %v1275_v58 = vpop.f32.mrf.mxu1 }
 0x236   :  { %v1276_v3 = vadd.f32 %v1275_v58, %v1234_v57 }
 0x237   :  { %v1236_v59 = vpop.f32.mrf.mxu0  ;;  %v1277_v60 = vpop.f32.mrf.mxu1 }
 0x239   :  { %v1237_v61 = vpop.f32.mrf.mxu0  ;;  %v1278_v62 = vpop.f32.mrf.mxu1 }
 0x273   :  { %v1314_v1 = vpop.f32.mrf.mxu0  ;;  %v1355_v2 = vpop.f32.mrf.mxu1 }
 0x274   :  { %v1315_v4 = vadd.f32 %v1314_v1, %v1274_v56 }
 0x275   :  { %v1316_v6 = vpop.f32.mrf.mxu0  ;;  %v1357_v19 = vpop.f32.mrf.mxu1 }
 0x276   :  { %v2030_v16 = vadd.f32 %v1355_v2, %v1315_v4  ;;  %v1317_v32 = vadd.f32 %v1316_v6, %v1276_v3  ;;  %v1363_v2 = vld [vmem:[%s2063_s6] sm:$0x3] }
 0x277   :  { %v1318_v46 = vpop.f32.mrf.mxu0  ;;  %v1359_v31 = vpop.f32.mrf.mxu1 }
 0x278   :  { %v1364_v49 = vrot.slane %v2030_v16, 4  ;;  %v1376_v63 = vmul.f32 %v2030_v16, %v2030_v16  ;;  %v1358_v9 = vadd.f32 %v1357_v19, %v1317_v32 }
 0x279   :  { %v1319_v17 = vpop.f32.mrf.mxu0  ;;  %v1360_v5 = vpop.f32.mrf.mxu1 }
 0x27a   :  { %v1365_v10 = vadd.f32 %v1364_v49, %v2030_v16  ;;  %v1378_v30 = vrot.slane %v1376_v63, 4  ;;  %v1370_v21 = vrot.slane %v1358_v9, 4  ;;  %v1377_v22 = vmul.f32 %v1358_v9, %v1358_v9 }
 0x27c   :  { %v1366_v23 = vrot.slane %v1365_v10, 2  ;;  %v1379_v24 = vadd.f32 %v1378_v30, %v1376_v63  ;;  %v1371_v11 = vadd.f32 %v1370_v21, %v1358_v9  ;;  %v1384_v20 = vrot.slane %v1377_v22, 4 }
 0x27e   :  { %v1367_v25 = vadd.f32 %v1366_v23, %v1365_v10  ;;  %v1380_v26 = vrot.slane %v1379_v24, 2  ;;  %v1372_v27 = vrot.slane %v1371_v11, 2  ;;  %v1385_v33 = vadd.f32 %v1384_v20, %v1377_v22 }
 0x280   :  { %v1368_v34 = vrot.slane %v1367_v25, 1  ;;  %v1381_v7 = vadd.f32 %v1380_v26, %v1379_v24  ;;  %v1373_v8 = vadd.f32 %v1372_v27, %v1371_v11  ;;  %v1386_v35 = vrot.slane %v1385_v33, 2 }
 0x282   :  { %v1369_v36 = vadd.f32 %v1368_v34, %v1367_v25  ;;  %v1382_v28 = vrot.slane %v1381_v7, 1  ;;  %v1374_v29 = vrot.slane %v1373_v8, 1  ;;  %v1387_v37 = vadd.f32 %v1386_v35, %v1385_v33 }
 0x284   :  { %v1383_v14 = vadd.f32 %v1382_v28, %v1381_v7  ;;  %v1390_v39 = vmul.f32 0.125, %v1369_v36  ;;  %v1375_v15 = vadd.f32 %v1374_v29, %v1373_v8  ;;  %v1388_v48 = vrot.slane %v1387_v37, 1 }
 0x286   :  { %v1392_v12 = vmul.f32 0.125, %v1383_v14  ;;  %v1394_v50 = vmul.f32 %v1390_v39, %v1390_v39  ;;  %v1389_v13 = vadd.f32 %v1388_v48, %v1387_v37  ;;  %v1391_v47 = vmul.f32 0.125, %v1375_v15 }
 0x288   :  { %v1396_v0 = vsub.f32 %v1392_v12, %v1394_v50  ;;  %v1393_v51 = vmul.f32 0.125, %v1389_v13  ;;  %v1395_v45 = vmul.f32 %v1391_v47, %v1391_v47 }
 0x28a   :  { %v1398_v52 = vadd.f32 1e-05, %v1396_v0  ;;  %v1397_v40 = vsub.f32 %v1393_v51, %v1395_v45 }
 0x28c   :  { %v1399_v42 = vadd.f32 1e-05, %v1397_v40  ;;  %1633 = vrsqrt.f32 %v1398_v52 }
 0x28e   :  { %1635 = vrsqrt.f32 %v1399_v42 }
 0x299   :  { %v1634_v38 = vpop.eup %1633 }
 0x29b   :  { %v1636_v41 = vpop.eup %1635 }
 0x29c   :  { %v1404_v53 = vcombine.low %v1634_v38, %v1636_v41 }
 0x29e   :  { %v1411_v54 = vrot.slane %v1404_v53, %v1876_v18 }
 0x2a0   :  { %v1418_v56 = vrot.slane %v1411_v54, %v1876_v18 }
 0x2a2   :  { %v1420_v57 = vmul.f32 %v1418_v56, %v1362_v55 }
 0x2a4   :  { %v1425_v58 = vrot.slane %v1420_v57, %v1892_v43  ;;  %v1429_v59 = vrot.slane %v1420_v57, %v1895_v44 }
 0x2a6   :  { %v1432_v60 = vmul.f32 %v1425_v58, %v1390_v39  ;;  %v1433_v61 = vmul.f32 %v1429_v59, %v1391_v47  ;;  %v1454_v6 = vmul.f32 %v1429_v59, %v1358_v9  ;;  %v1453_v32 = vmul.f32 %v1425_v58, %v2030_v16 }
 0x2a8   :  { %v1436_v62 = vcombine.low %v1432_v60, %v1433_v61 }
 0x2aa   :  { %v1443_v1 = vrot.slane %v1436_v62, %v1876_v18 }
 0x2ac   :  { %v1450_v3 = vrot.slane %v1443_v1, %v1876_v18  ;;  %v1585_v18 = vld [vmem:[%s2065_s8] ss:$0 sm:$0xff] }
 0x2ae   :  { %v1452_v4 = vsub.f32 %v1363_v2, %v1450_v3 }
 0x2b0   :  { %v1463_v19 = vrot.slane %v1452_v4, %v1895_v44  ;;  %v1459_v46 = vrot.slane %v1452_v4, %v1892_v43 }
 0x2b2   :  { %v1467_v31 = vadd.f32 %v1463_v19, %v1454_v6  ;;  %v1466_v49 = vadd.f32 %v1459_v46, %v1453_v32 }
 0x2b4   :  { %v1469_v63 = vmax.f32 %v1467_v31, 0.0  ;;  %v1468_v17 = vmax.f32 %v1466_v49, 0.0 }
 0x2b6   :  { %v1471_v5 = vpack.c.bf16 %v1469_v63, %v1469_v63  ;;  %v1470_v10 = vpack.c.bf16 %v1468_v17, %v1468_v17 }
 0x2b8   :  { %1559 = vmatprep.mubr.bf16.mxu0 %v1471_v5 }
 0x2b9   :  { %1560 = vmatmul.mubr.bf16.vlgmr.msra.gmra.mxu0 %v1470_v10 }
 0x379   :  { %v1602_v30 = vpop.f32.mrf.mxu0 }
 0x37b   :  { %v1603_v9 = vpop.f32.mrf.mxu0 }
 0x37c   :  { %v1604_v44 = vadd.f32 %v1603_v9, %v1602_v30 }
 0x37d   :  { %v1605_v16 = vpop.f32.mrf.mxu0 }
 0x37e   :  { %v1562_v43 = vadd.f32 %v1604_v44, %v1585_v18 }
 0x37f   :  { %v1606_v21 = vpop.f32.mrf.mxu0 }
 0x380   :  { %1568 = vst.msk [vmem:[#allocation7] sm:$0xff] %vm1567_vm0, %v1562_v43 }
 0x381   :  { %1688 = shalt.err (!%p1685_p0)
}
 0x382   :  { %1578 = dma.vmem_to_hbm [thread:$0]  %s1576_s19, 128, %s2066_s9, [#allocation4]  }
 0x383   :  { %1701 = dma.done.wait [#allocation4], 128  }
 0x384   :  { %1702 = vsyncadd [#allocation4], 4294967168 }
 0x385   :  { %1582 = vsyncpa [#allocation3], 1 }
 0x386   :  { %1583 = vsyncpa [#allocation6], 1 }
 0x387   :  { %1584 = vsyncpa [#allocation4], 1 }

</bundles_post_ra>
